<compile_context>
chip_gen: v7x
topology: tpu7x:2x2x1
jax: 0.10.0
libtpu: 0.0.40
codegen_flags: <defaults>
</compile_context>

<pallas_src>
import functools

import jax
import jax.numpy as jnp
from jax import lax
from jax.experimental import pallas as pl
from jax.experimental.pallas import tpu as pltpu

LANE = 128


def _gru_seq_kernel(ids_ref, emb_hbm, wih_ref, whh_ref, bih_ref, bhh_ref, h0_ref,
                    out_ref, x_buf, row_sems, h_scratch, *, vocab, bs, H):
    """Per-step embedding row gather (double-buffered) + GRU cell, h carried in VMEM."""
    t = pl.program_id(0)
    T = pl.num_programs(0)

    def start_gather(step, slot):
        # Gather the bs embedding rows for time `step` into buffer `slot`.
        for b in range(bs):                                   # bs small & static -> unrolled
            idx = ids_ref[step, b]                            # scalar int32 from SMEM
            idx = jnp.minimum(jnp.maximum(idx, 0), vocab - 1)  # clamp in-kernel (no OOB DMA)
            pltpu.make_async_copy(
                emb_hbm.at[pl.ds(idx, 1), :],                 # (1, E_pad) row in HBM
                x_buf.at[slot, pl.ds(b, 1), :],               # (1, E_pad) row in VMEM
                row_sems.at[slot, b]).start()

    def wait_gather(slot):
        for b in range(bs):
            pltpu.make_async_copy(
                emb_hbm.at[pl.ds(0, 1), :],                   # shape-only src; wait is on sem
                x_buf.at[slot, pl.ds(b, 1), :],
                row_sems.at[slot, b]).wait()

    @pl.when(t == 0)
    def _():
        h_scratch[...] = h0_ref[0]                            # fold reshape/astype into kernel
        start_gather(0, 0)                                    # prime the gather pipeline

    slot = lax.rem(t, 2)
    wait_gather(slot)

    @pl.when(t + 1 < T)
    def _():
        start_gather(t + 1, 1 - slot)                         # prefetch next step's rows
                                                              # (overlaps with compute below)

    h = h_scratch[...]                                        # (bs, H) f32 carried state
    # Hidden-side matmul in f32 (keeps carried state exact across steps).
    gh = jnp.dot(h, whh_ref[...],
                 preferred_element_type=jnp.float32) + bhh_ref[...]      # (bs, 3H)
    # Input-side matmul in bf16 (full-rate MXU) with f32 accumulation.
    x = x_buf[slot].astype(jnp.bfloat16)                      # (bs, E_pad)
    gi = jnp.dot(x, wih_ref[...],
                 preferred_element_type=jnp.float32) + bih_ref[...]      # (bs, 3H)

    # GRU gates, PyTorch order [r | z | n]; elementwise math in f32.
    i_r, i_z, i_n = gi[:, 0:H], gi[:, H:2 * H], gi[:, 2 * H:3 * H]
    h_r, h_z, h_n = gh[:, 0:H], gh[:, H:2 * H], gh[:, 2 * H:3 * H]
    r = jax.nn.sigmoid(i_r + h_r)
    z = jax.nn.sigmoid(i_z + h_z)
    n = jnp.tanh(i_n + r * h_n)                               # b_hn stays inside r*(...)
    h_new = n + z * (h - n)                                   # == (1-z)*n + z*h, one op fewer

    h_scratch[...] = h_new
    out_ref[0] = h_new.astype(out_ref.dtype)


def encoder_rnn_sequence(ids_seq, hidden, params):
    """Run T GRU steps in one pallas_call.

    ids_seq: (T, bs) int token ids; hidden: (1, bs, H) f32.
    Returns (output (T, bs, H), hidden (1, bs, H)) — PyTorch nn.GRU semantics.
    """
    T, bs = ids_seq.shape
    H = hidden.shape[-1]
    vocab, E_pad = params["emb"].shape
    ids_seq = ids_seq.astype(jnp.int32)
    hidden = hidden.astype(jnp.float32)

    kernel = functools.partial(_gru_seq_kernel, vocab=vocab, bs=bs, H=H)

    nbytes = lambda a: a.size * a.dtype.itemsize
    # Real VMEM footprint: 2x (pipeline buffers) for BlockSpec inputs/outputs,
    # plus the gather double-buffer and the h carry scratch.
    vmem_bytes = (2 * (nbytes(params["wih_t"]) + nbytes(params["whh_t"])
                       + nbytes(params["b_ih"]) + nbytes(params["b_hh"]))
                  + 2 * bs * H * 4              # h0 input block
                  + 2 * bs * H * 4              # out block
                  + 2 * bs * E_pad * 4          # x gather double-buffer
                  + bs * H * 4)                 # carried hidden
    vmem_limit = vmem_bytes + (4 << 20)         # headroom for internal scratch

    cost = pl.CostEstimate(
        flops=2 * T * bs * (E_pad + H) * 3 * H,
        transcendentals=3 * T * bs * H,
        bytes_accessed=(nbytes(params["wih_t"]) + nbytes(params["whh_t"])
                        + T * bs * E_pad * 4 + 2 * T * bs * H * 4),
    )

    grid_spec = pltpu.PrefetchScalarGridSpec(
        num_scalar_prefetch=1,                                       # ids table -> SMEM
        grid=(T,),
        in_specs=[
            pl.BlockSpec(memory_space=pl.ANY),                       # emb table stays in HBM
            pl.BlockSpec((E_pad, 3 * H), lambda t, ids: (0, 0)),     # W_ih^T: VMEM-resident
            pl.BlockSpec((H, 3 * H), lambda t, ids: (0, 0)),         # W_hh^T: VMEM-resident
            pl.BlockSpec((1, 3 * H), lambda t, ids: (0, 0)),         # b_ih
            pl.BlockSpec((1, 3 * H), lambda t, ids: (0, 0)),         # b_hh
            pl.BlockSpec((1, bs, H), lambda t, ids: (0, 0, 0)),      # h0
        ],
        out_specs=pl.BlockSpec((1, bs, H), lambda t, ids: (t, 0, 0)),
        scratch_shapes=[
            pltpu.VMEM((2, bs, E_pad), jnp.float32),   # double-buffered gathered rows
            pltpu.SemaphoreType.DMA((2, bs)),          # one sem per row per buffer
            pltpu.VMEM((bs, H), jnp.float32),          # carried hidden state
        ],
    )

    out = pl.pallas_call(
        kernel,
        out_shape=jax.ShapeDtypeStruct((T, bs, H), jnp.float32),
        grid_spec=grid_spec,
        compiler_params=pltpu.CompilerParams(
            # Time carries h -> "arbitrary". On v7x, add a leading batch grid
            # axis marked "parallel" only once batch reaches a few hundred rows.
            dimension_semantics=("arbitrary",),
            vmem_limit_bytes=vmem_limit),
        cost_estimate=cost,
    )(ids_seq, params["emb"], params["wih_t"], params["whh_t"],
      params["b_ih"], params["b_hh"], hidden)

    return out, out[-1:]                     # 1-layer GRU: hidden == last output


def encoder_rnn_forward(inputs, hidden, params):
    """EncoderRNN.forward: one time step. inputs: (bs,) or (1, bs) token ids."""
    ids_seq = inputs.reshape(1, -1)
    out, h_new = encoder_rnn_sequence(ids_seq, hidden, params)
    return out, h_new


def ref_sequence(ids_seq, hidden, params, *, full_f32=False):
    """Pure-JAX reference. full_f32=False mirrors kernel dtypes; True = f32 numerics."""
    T, _ = ids_seq.shape
    H = hidden.shape[-1]
    vocab = params["emb"].shape[0]
    wih_f32 = params["wih_t"].astype(jnp.float32)
    whh = params["whh_t"].astype(jnp.float32)
    h = hidden[0].astype(jnp.float32)
    outs = []
    for t in range(T):
        ids = jnp.clip(ids_seq[t].astype(jnp.int32), 0, vocab - 1)
        x = params["emb"][ids]
        if full_f32:
            gi = jnp.dot(x.astype(jnp.float32), wih_f32) + params["b_ih"]
        else:
            gi = jnp.dot(x.astype(jnp.bfloat16), params["wih_t"],
                         preferred_element_type=jnp.float32) + params["b_ih"]
        gh = jnp.dot(h, whh, preferred_element_type=jnp.float32) + params["b_hh"]
        i_r, i_z, i_n = gi[:, :H], gi[:, H:2 * H], gi[:, 2 * H:]
        h_r, h_z, h_n = gh[:, :H], gh[:, H:2 * H], gh[:, 2 * H:]
        r = jax.nn.sigmoid(i_r + h_r)
        z = jax.nn.sigmoid(i_z + h_z)
        n = jnp.tanh(i_n + r * h_n)
        h = n + z * (h - n)
        outs.append(h)
    out = jnp.stack(outs)
    return out, out[-1:]


if __name__ == "__main__":
    # Small stand-ins for (len(DE.vocab), 300, 256, 32); E=300 exercises the
    # lane-padding path (padded to 384).
    VOCAB, EMB, HIDDEN, BS, SEQ = 512, 300, 128, 8, 6
    E_PAD = ((EMB + LANE - 1) // LANE) * LANE            # 384

    key = jax.random.PRNGKey(0)
    k_emb, k_wih, k_whh, k_bih, k_bhh, k_ids = jax.random.split(key, 6)

    emb = 0.1 * jax.random.normal(k_emb, (VOCAB, EMB), jnp.float32)
    wih = 0.1 * jax.random.normal(k_wih, (EMB, 3 * HIDDEN), jnp.float32)
    whh = 0.1 * jax.random.normal(k_whh, (HIDDEN, 3 * HIDDEN), jnp.float32)
    bih = 0.1 * jax.random.normal(k_bih, (1, 3 * HIDDEN), jnp.float32)
    bhh = 0.1 * jax.random.normal(k_bhh, (1, 3 * HIDDEN), jnp.float32)

    params = {
        # f32 table in HBM; only bs rows per step are gathered.
        # TODO(synk): a bf16 table would halve gather bytes, but single-row DMA
        # into a sublane-packed bf16 buffer needs the pltpu.bitcast row-pair trick.
        "emb":   jnp.pad(emb, ((0, 0), (0, E_PAD - EMB))),                        # f32, HBM
        "wih_t": jnp.pad(wih, ((0, E_PAD - EMB), (0, 0))).astype(jnp.bfloat16),   # (E_PAD, 3H)
        "whh_t": whh,                                                             # (H, 3H) f32
        "b_ih":  bih,
        "b_hh":  bhh,
    }

    ids_seq = jax.random.randint(k_ids, (SEQ, BS), 0, VOCAB, dtype=jnp.int32)
    hidden0 = jnp.zeros((1, BS, HIDDEN), jnp.float32)     # EncoderRNN.initHidden()

    # Full-sequence call: amortizes dispatch, weight DMA and gather latency over T.
    outs, h_last = encoder_rnn_sequence(ids_seq, hidden0, params)
    outs, h_last = jax.block_until_ready(outs), jax.block_until_ready(h_last)

    # Single-step call: exactly EncoderRNN.forward(inputs, hidden).
    out1, h1 = encoder_rnn_forward(ids_seq[0], hidden0, params)
    out1, h1 = jax.block_until_ready(out1), jax.block_until_ready(h1)

    ref_out, ref_h = ref_sequence(ids_seq, hidden0, params)                  # kernel dtypes
    f32_out, f32_h = ref_sequence(ids_seq, hidden0, params, full_f32=True)   # f32 numerics

    assert outs.shape == (SEQ, BS, HIDDEN) and h_last.shape == (1, BS, HIDDEN)
    assert out1.shape == (1, BS, HIDDEN) and h1.shape == (1, BS, HIDDEN)
    assert jnp.allclose(outs, ref_out, atol=2e-3, rtol=2e-3)
    assert jnp.allclose(h_last, ref_h, atol=2e-3, rtol=2e-3)
    assert jnp.allclose(out1, ref_out[:1], atol=2e-3, rtol=2e-3)
    assert jnp.allclose(h1, ref_out[:1], atol=2e-3, rtol=2e-3)
    # Quantify bf16-weight error against pure-f32 (PyTorch-like) numerics.
    assert jnp.allclose(outs, f32_out, atol=3e-2, rtol=3e-2)
    assert jnp.allclose(h_last, f32_h, atol=3e-2, rtol=3e-2)

    print("KERNEL_OK")
</pallas_src>

<mosaic_0001>
module attributes {stable_mosaic.version = 11 : i64} {
  func.func @_gru_seq_kernel(%arg0: i32, %arg1: memref<6x8xi32, #tpu.memory_space<smem>>, %arg2: memref<512x384xf32, #tpu.memory_space<any>>, %arg3: memref<384x384xbf16, #tpu.memory_space<vmem>>, %arg4: memref<128x384xf32, #tpu.memory_space<vmem>>, %arg5: memref<1x384xf32, #tpu.memory_space<vmem>>, %arg6: memref<1x384xf32, #tpu.memory_space<vmem>>, %arg7: memref<1x8x128xf32, #tpu.memory_space<vmem>>, %arg8: memref<1x8x128xf32, #tpu.memory_space<vmem>>, %arg9: memref<2x8x384xf32, #tpu.memory_space<vmem>>, %arg10: memref<2x8x!tpu.dma_semaphore, #tpu.memory_space<semaphore_mem>>, %arg11: memref<8x128xf32, #tpu.memory_space<vmem>>) attributes {dimension_semantics = [#tpu.dimension_semantics<arbitrary>], iteration_bounds = array<i64: 6>, scalar_prefetch = 1 : i64, scratch_operands = 3 : i64, tpu.core_type = #tpu.core_type<tc>, window_params = [{}, {pipeline_mode = #tpu.pipeline_mode<synchronous>, transform_indices = @transform_1, window_bounds = array<i64: 384, 384>}, {pipeline_mode = #tpu.pipeline_mode<synchronous>, transform_indices = @transform_2, window_bounds = array<i64: 128, 384>}, {pipeline_mode = #tpu.pipeline_mode<synchronous>, transform_indices = @transform_3, window_bounds = array<i64: 1, 384>}, {pipeline_mode = #tpu.pipeline_mode<synchronous>, transform_indices = @transform_4, window_bounds = array<i64: 1, 384>}, {pipeline_mode = #tpu.pipeline_mode<synchronous>, transform_indices = @transform_5, window_bounds = array<i64: 1, 8, 128>}, {transform_indices = @transform_6, window_bounds = array<i64: 1, 8, 128>}]} {
    %c0_i32 = arith.constant 0 : i32
    %0 = arith.cmpi eq, %arg0, %c0_i32 : i32
    %1 = arith.extui %0 : i1 to i32
    %c0_i32_0 = arith.constant 0 : i32
    %2 = arith.cmpi ne, %1, %c0_i32_0 : i32
    scf.if %2 {
      %c0_57 = arith.constant 0 : index
      %c0_58 = arith.constant 0 : index
      %c0_59 = arith.constant 0 : index
      %91 = vector.load %arg7[%c0_57, %c0_58, %c0_59] : memref<1x8x128xf32, #tpu.memory_space<vmem>>, vector<1x8x128xf32>
      %92 = vector.shape_cast %91 : vector<1x8x128xf32> to vector<8x128xf32>
      %c0_60 = arith.constant 0 : index
      %c0_61 = arith.constant 0 : index
      %93 = vector.load %arg11[%c0_60, %c0_61] : memref<8x128xf32, #tpu.memory_space<vmem>>, vector<8x128xf32>
      tpu.vector_store %arg11[%c0_60, %c0_61], %92 {strides = array<i32>} : memref<8x128xf32, #tpu.memory_space<vmem>>, vector<8x128xf32>,
      %c0_62 = arith.constant 0 : index
      %c0_63 = arith.constant 0 : index
      %94 = memref.load %arg1[%c0_62, %c0_63] : memref<6x8xi32, #tpu.memory_space<smem>>
      %c0_i32_64 = arith.constant 0 : i32
      %95 = arith.maxsi %94, %c0_i32_64 : i32
      %c511_i32 = arith.constant 511 : i32
      %96 = arith.minsi %95, %c511_i32 : i32
      %c0_i32_65 = arith.constant 0 : i32
      %c0_i32_66 = arith.constant 0 : i32
      %c0_i32_67 = arith.constant 0 : i32
      %c0_i32_68 = arith.constant 0 : i32
      %97 = tpu.memref_slice %arg2[%96, %c0_i32_68] : memref<512x384xf32, #tpu.memory_space<any>> -> memref<1x384xf32, #tpu.memory_space<any>>
      %c0_i32_69 = arith.constant 0 : i32
      %c0_i32_70 = arith.constant 0 : i32
      %98 = tpu.memref_slice %arg9[%c0_i32_65, %c0_i32_69, %c0_i32_70] : memref<2x8x384xf32, #tpu.memory_space<vmem>> -> memref<1x1x384xf32, #tpu.memory_space<vmem>>
      %99 = tpu.memref_squeeze %98 : memref<1x1x384xf32, #tpu.memory_space<vmem>> -> memref<1x384xf32, #tpu.memory_space<vmem>>
      %100 = tpu.memref_slice %arg10[%c0_i32_66, %c0_i32_67] : memref<2x8x!tpu.dma_semaphore, #tpu.memory_space<semaphore_mem>> -> memref<1x1x!tpu.dma_semaphore, #tpu.memory_space<semaphore_mem>>
      %101 = tpu.memref_squeeze %100 : memref<1x1x!tpu.dma_semaphore, #tpu.memory_space<semaphore_mem>> -> memref<!tpu.dma_semaphore, #tpu.memory_space<semaphore_mem>>
      tpu.enqueue_dma source(%97 : memref<1x384xf32, #tpu.memory_space<any>>) target(%99 : memref<1x384xf32, #tpu.memory_space<vmem>>) target_semaphore(%101 : memref<!tpu.dma_semaphore, #tpu.memory_space<semaphore_mem>>)
      %c0_71 = arith.constant 0 : index
      %c1 = arith.constant 1 : index
      %102 = memref.load %arg1[%c0_71, %c1] : memref<6x8xi32, #tpu.memory_space<smem>>
      %c0_i32_72 = arith.constant 0 : i32
      %103 = arith.maxsi %102, %c0_i32_72 : i32
      %c511_i32_73 = arith.constant 511 : i32
      %104 = arith.minsi %103, %c511_i32_73 : i32
      %c0_i32_74 = arith.constant 0 : i32
      %c0_i32_75 = arith.constant 0 : i32
      %c1_i32_76 = arith.constant 1 : i32
      %c0_i32_77 = arith.constant 0 : i32
      %105 = tpu.memref_slice %arg2[%104, %c0_i32_77] : memref<512x384xf32, #tpu.memory_space<any>> -> memref<1x384xf32, #tpu.memory_space<any>>
      %c1_i32_78 = arith.constant 1 : i32
      %c0_i32_79 = arith.constant 0 : i32
      %106 = tpu.memref_slice %arg9[%c0_i32_74, %c1_i32_78, %c0_i32_79] : memref<2x8x384xf32, #tpu.memory_space<vmem>> -> memref<1x1x384xf32, #tpu.memory_space<vmem>>
      %107 = tpu.memref_squeeze %106 : memref<1x1x384xf32, #tpu.memory_space<vmem>> -> memref<1x384xf32, #tpu.memory_space<vmem>>
      %108 = tpu.memref_slice %arg10[%c0_i32_75, %c1_i32_76] : memref<2x8x!tpu.dma_semaphore, #tpu.memory_space<semaphore_mem>> -> memref<1x1x!tpu.dma_semaphore, #tpu.memory_space<semaphore_mem>>
      %109 = tpu.memref_squeeze %108 : memref<1x1x!tpu.dma_semaphore, #tpu.memory_space<semaphore_mem>> -> memref<!tpu.dma_semaphore, #tpu.memory_space<semaphore_mem>>
      tpu.enqueue_dma source(%105 : memref<1x384xf32, #tpu.memory_space<any>>) target(%107 : memref<1x384xf32, #tpu.memory_space<vmem>>) target_semaphore(%109 : memref<!tpu.dma_semaphore, #tpu.memory_space<semaphore_mem>>)
      %c0_80 = arith.constant 0 : index
      %c2 = arith.constant 2 : index
      %110 = memref.load %arg1[%c0_80, %c2] : memref<6x8xi32, #tpu.memory_space<smem>>
      %c0_i32_81 = arith.constant 0 : i32
      %111 = arith.maxsi %110, %c0_i32_81 : i32
      %c511_i32_82 = arith.constant 511 : i32
      %112 = arith.minsi %111, %c511_i32_82 : i32
      %c0_i32_83 = arith.constant 0 : i32
      %c0_i32_84 = arith.constant 0 : i32
      %c2_i32_85 = arith.constant 2 : i32
      %c0_i32_86 = arith.constant 0 : i32
      %113 = tpu.memref_slice %arg2[%112, %c0_i32_86] : memref<512x384xf32, #tpu.memory_space<any>> -> memref<1x384xf32, #tpu.memory_space<any>>
      %c2_i32_87 = arith.constant 2 : i32
      %c0_i32_88 = arith.constant 0 : i32
      %114 = tpu.memref_slice %arg9[%c0_i32_83, %c2_i32_87, %c0_i32_88] : memref<2x8x384xf32, #tpu.memory_space<vmem>> -> memref<1x1x384xf32, #tpu.memory_space<vmem>>
      %115 = tpu.memref_squeeze %114 : memref<1x1x384xf32, #tpu.memory_space<vmem>> -> memref<1x384xf32, #tpu.memory_space<vmem>>
      %116 = tpu.memref_slice %arg10[%c0_i32_84, %c2_i32_85] : memref<2x8x!tpu.dma_semaphore, #tpu.memory_space<semaphore_mem>> -> memref<1x1x!tpu.dma_semaphore, #tpu.memory_space<semaphore_mem>>
      %117 = tpu.memref_squeeze %116 : memref<1x1x!tpu.dma_semaphore, #tpu.memory_space<semaphore_mem>> -> memref<!tpu.dma_semaphore, #tpu.memory_space<semaphore_mem>>
      tpu.enqueue_dma source(%113 : memref<1x384xf32, #tpu.memory_space<any>>) target(%115 : memref<1x384xf32, #tpu.memory_space<vmem>>) target_semaphore(%117 : memref<!tpu.dma_semaphore, #tpu.memory_space<semaphore_mem>>)
      %c0_89 = arith.constant 0 : index
      %c3 = arith.constant 3 : index
      %118 = memref.load %arg1[%c0_89, %c3] : memref<6x8xi32, #tpu.memory_space<smem>>
      %c0_i32_90 = arith.constant 0 : i32
      %119 = arith.maxsi %118, %c0_i32_90 : i32
      %c511_i32_91 = arith.constant 511 : i32
      %120 = arith.minsi %119, %c511_i32_91 : i32
      %c0_i32_92 = arith.constant 0 : i32
      %c0_i32_93 = arith.constant 0 : i32
      %c3_i32_94 = arith.constant 3 : i32
      %c0_i32_95 = arith.constant 0 : i32
      %121 = tpu.memref_slice %arg2[%120, %c0_i32_95] : memref<512x384xf32, #tpu.memory_space<any>> -> memref<1x384xf32, #tpu.memory_space<any>>
      %c3_i32_96 = arith.constant 3 : i32
      %c0_i32_97 = arith.constant 0 : i32
      %122 = tpu.memref_slice %arg9[%c0_i32_92, %c3_i32_96, %c0_i32_97] : memref<2x8x384xf32, #tpu.memory_space<vmem>> -> memref<1x1x384xf32, #tpu.memory_space<vmem>>
      %123 = tpu.memref_squeeze %122 : memref<1x1x384xf32, #tpu.memory_space<vmem>> -> memref<1x384xf32, #tpu.memory_space<vmem>>
      %124 = tpu.memref_slice %arg10[%c0_i32_93, %c3_i32_94] : memref<2x8x!tpu.dma_semaphore, #tpu.memory_space<semaphore_mem>> -> memref<1x1x!tpu.dma_semaphore, #tpu.memory_space<semaphore_mem>>
      %125 = tpu.memref_squeeze %124 : memref<1x1x!tpu.dma_semaphore, #tpu.memory_space<semaphore_mem>> -> memref<!tpu.dma_semaphore, #tpu.memory_space<semaphore_mem>>
      tpu.enqueue_dma source(%121 : memref<1x384xf32, #tpu.memory_space<any>>) target(%123 : memref<1x384xf32, #tpu.memory_space<vmem>>) target_semaphore(%125 : memref<!tpu.dma_semaphore, #tpu.memory_space<semaphore_mem>>)
      %c0_98 = arith.constant 0 : index
      %c4 = arith.constant 4 : index
      %126 = memref.load %arg1[%c0_98, %c4] : memref<6x8xi32, #tpu.memory_space<smem>>
      %c0_i32_99 = arith.constant 0 : i32
      %127 = arith.maxsi %126, %c0_i32_99 : i32
      %c511_i32_100 = arith.constant 511 : i32
      %128 = arith.minsi %127, %c511_i32_100 : i32
      %c0_i32_101 = arith.constant 0 : i32
      %c0_i32_102 = arith.constant 0 : i32
      %c4_i32_103 = arith.constant 4 : i32
      %c0_i32_104 = arith.constant 0 : i32
      %129 = tpu.memref_slice %arg2[%128, %c0_i32_104] : memref<512x384xf32, #tpu.memory_space<any>> -> memref<1x384xf32, #tpu.memory_space<any>>
      %c4_i32_105 = arith.constant 4 : i32
      %c0_i32_106 = arith.constant 0 : i32
      %130 = tpu.memref_slice %arg9[%c0_i32_101, %c4_i32_105, %c0_i32_106] : memref<2x8x384xf32, #tpu.memory_space<vmem>> -> memref<1x1x384xf32, #tpu.memory_space<vmem>>
      %131 = tpu.memref_squeeze %130 : memref<1x1x384xf32, #tpu.memory_space<vmem>> -> memref<1x384xf32, #tpu.memory_space<vmem>>
      %132 = tpu.memref_slice %arg10[%c0_i32_102, %c4_i32_103] : memref<2x8x!tpu.dma_semaphore, #tpu.memory_space<semaphore_mem>> -> memref<1x1x!tpu.dma_semaphore, #tpu.memory_space<semaphore_mem>>
      %133 = tpu.memref_squeeze %132 : memref<1x1x!tpu.dma_semaphore, #tpu.memory_space<semaphore_mem>> -> memref<!tpu.dma_semaphore, #tpu.memory_space<semaphore_mem>>
      tpu.enqueue_dma source(%129 : memref<1x384xf32, #tpu.memory_space<any>>) target(%131 : memref<1x384xf32, #tpu.memory_space<vmem>>) target_semaphore(%133 : memref<!tpu.dma_semaphore, #tpu.memory_space<semaphore_mem>>)
      %c0_107 = arith.constant 0 : index
      %c5 = arith.constant 5 : index
      %134 = memref.load %arg1[%c0_107, %c5] : memref<6x8xi32, #tpu.memory_space<smem>>
      %c0_i32_108 = arith.constant 0 : i32
      %135 = arith.maxsi %134, %c0_i32_108 : i32
      %c511_i32_109 = arith.constant 511 : i32
      %136 = arith.minsi %135, %c511_i32_109 : i32
      %c0_i32_110 = arith.constant 0 : i32
      %c0_i32_111 = arith.constant 0 : i32
      %c5_i32_112 = arith.constant 5 : i32
      %c0_i32_113 = arith.constant 0 : i32
      %137 = tpu.memref_slice %arg2[%136, %c0_i32_113] : memref<512x384xf32, #tpu.memory_space<any>> -> memref<1x384xf32, #tpu.memory_space<any>>
      %c5_i32_114 = arith.constant 5 : i32
      %c0_i32_115 = arith.constant 0 : i32
      %138 = tpu.memref_slice %arg9[%c0_i32_110, %c5_i32_114, %c0_i32_115] : memref<2x8x384xf32, #tpu.memory_space<vmem>> -> memref<1x1x384xf32, #tpu.memory_space<vmem>>
      %139 = tpu.memref_squeeze %138 : memref<1x1x384xf32, #tpu.memory_space<vmem>> -> memref<1x384xf32, #tpu.memory_space<vmem>>
      %140 = tpu.memref_slice %arg10[%c0_i32_111, %c5_i32_112] : memref<2x8x!tpu.dma_semaphore, #tpu.memory_space<semaphore_mem>> -> memref<1x1x!tpu.dma_semaphore, #tpu.memory_space<semaphore_mem>>
      %141 = tpu.memref_squeeze %140 : memref<1x1x!tpu.dma_semaphore, #tpu.memory_space<semaphore_mem>> -> memref<!tpu.dma_semaphore, #tpu.memory_space<semaphore_mem>>
      tpu.enqueue_dma source(%137 : memref<1x384xf32, #tpu.memory_space<any>>) target(%139 : memref<1x384xf32, #tpu.memory_space<vmem>>) target_semaphore(%141 : memref<!tpu.dma_semaphore, #tpu.memory_space<semaphore_mem>>)
      %c0_116 = arith.constant 0 : index
      %c6 = arith.constant 6 : index
      %142 = memref.load %arg1[%c0_116, %c6] : memref<6x8xi32, #tpu.memory_space<smem>>
      %c0_i32_117 = arith.constant 0 : i32
      %143 = arith.maxsi %142, %c0_i32_117 : i32
      %c511_i32_118 = arith.constant 511 : i32
      %144 = arith.minsi %143, %c511_i32_118 : i32
      %c0_i32_119 = arith.constant 0 : i32
      %c0_i32_120 = arith.constant 0 : i32
      %c6_i32_121 = arith.constant 6 : i32
      %c0_i32_122 = arith.constant 0 : i32
      %145 = tpu.memref_slice %arg2[%144, %c0_i32_122] : memref<512x384xf32, #tpu.memory_space<any>> -> memref<1x384xf32, #tpu.memory_space<any>>
      %c6_i32_123 = arith.constant 6 : i32
      %c0_i32_124 = arith.constant 0 : i32
      %146 = tpu.memref_slice %arg9[%c0_i32_119, %c6_i32_123, %c0_i32_124] : memref<2x8x384xf32, #tpu.memory_space<vmem>> -> memref<1x1x384xf32, #tpu.memory_space<vmem>>
      %147 = tpu.memref_squeeze %146 : memref<1x1x384xf32, #tpu.memory_space<vmem>> -> memref<1x384xf32, #tpu.memory_space<vmem>>
      %148 = tpu.memref_slice %arg10[%c0_i32_120, %c6_i32_121] : memref<2x8x!tpu.dma_semaphore, #tpu.memory_space<semaphore_mem>> -> memref<1x1x!tpu.dma_semaphore, #tpu.memory_space<semaphore_mem>>
      %149 = tpu.memref_squeeze %148 : memref<1x1x!tpu.dma_semaphore, #tpu.memory_space<semaphore_mem>> -> memref<!tpu.dma_semaphore, #tpu.memory_space<semaphore_mem>>
      tpu.enqueue_dma source(%145 : memref<1x384xf32, #tpu.memory_space<any>>) target(%147 : memref<1x384xf32, #tpu.memory_space<vmem>>) target_semaphore(%149 : memref<!tpu.dma_semaphore, #tpu.memory_space<semaphore_mem>>)
      %c0_125 = arith.constant 0 : index
      %c7 = arith.constant 7 : index
      %150 = memref.load %arg1[%c0_125, %c7] : memref<6x8xi32, #tpu.memory_space<smem>>
      %c0_i32_126 = arith.constant 0 : i32
      %151 = arith.maxsi %150, %c0_i32_126 : i32
      %c511_i32_127 = arith.constant 511 : i32
      %152 = arith.minsi %151, %c511_i32_127 : i32
      %c0_i32_128 = arith.constant 0 : i32
      %c0_i32_129 = arith.constant 0 : i32
      %c7_i32_130 = arith.constant 7 : i32
      %c0_i32_131 = arith.constant 0 : i32
      %153 = tpu.memref_slice %arg2[%152, %c0_i32_131] : memref<512x384xf32, #tpu.memory_space<any>> -> memref<1x384xf32, #tpu.memory_space<any>>
      %c7_i32_132 = arith.constant 7 : i32
      %c0_i32_133 = arith.constant 0 : i32
      %154 = tpu.memref_slice %arg9[%c0_i32_128, %c7_i32_132, %c0_i32_133] : memref<2x8x384xf32, #tpu.memory_space<vmem>> -> memref<1x1x384xf32, #tpu.memory_space<vmem>>
      %155 = tpu.memref_squeeze %154 : memref<1x1x384xf32, #tpu.memory_space<vmem>> -> memref<1x384xf32, #tpu.memory_space<vmem>>
      %156 = tpu.memref_slice %arg10[%c0_i32_129, %c7_i32_130] : memref<2x8x!tpu.dma_semaphore, #tpu.memory_space<semaphore_mem>> -> memref<1x1x!tpu.dma_semaphore, #tpu.memory_space<semaphore_mem>>
      %157 = tpu.memref_squeeze %156 : memref<1x1x!tpu.dma_semaphore, #tpu.memory_space<semaphore_mem>> -> memref<!tpu.dma_semaphore, #tpu.memory_space<semaphore_mem>>
      tpu.enqueue_dma source(%153 : memref<1x384xf32, #tpu.memory_space<any>>) target(%155 : memref<1x384xf32, #tpu.memory_space<vmem>>) target_semaphore(%157 : memref<!tpu.dma_semaphore, #tpu.memory_space<semaphore_mem>>)
    } else {
    }
    %c2_i32 = arith.constant 2 : i32
    %3 = arith.remsi %arg0, %c2_i32 : i32
    %c0_i32_1 = arith.constant 0 : i32
    %c0_i32_2 = arith.constant 0 : i32
    %c0_i32_3 = arith.constant 0 : i32
    %4 = tpu.memref_slice %arg2[%c0_i32_2, %c0_i32_3] : memref<512x384xf32, #tpu.memory_space<any>> -> memref<1x384xf32, #tpu.memory_space<any>>
    %c0_i32_4 = arith.constant 0 : i32
    %c0_i32_5 = arith.constant 0 : i32
    %5 = tpu.memref_slice %arg9[%3, %c0_i32_4, %c0_i32_5] : memref<2x8x384xf32, #tpu.memory_space<vmem>> -> memref<1x1x384xf32, #tpu.memory_space<vmem>>
    %6 = tpu.memref_squeeze %5 : memref<1x1x384xf32, #tpu.memory_space<vmem>> -> memref<1x384xf32, #tpu.memory_space<vmem>>
    %7 = tpu.memref_slice %arg10[%3, %c0_i32_1] : memref<2x8x!tpu.dma_semaphore, #tpu.memory_space<semaphore_mem>> -> memref<1x1x!tpu.dma_semaphore, #tpu.memory_space<semaphore_mem>>
    %8 = tpu.memref_squeeze %7 : memref<1x1x!tpu.dma_semaphore, #tpu.memory_space<semaphore_mem>> -> memref<!tpu.dma_semaphore, #tpu.memory_space<semaphore_mem>>
    tpu.wait_dma2 semaphore(%8 : memref<!tpu.dma_semaphore, #tpu.memory_space<semaphore_mem>>) src(%4 : memref<1x384xf32, #tpu.memory_space<any>>) dst(%6 : memref<1x384xf32, #tpu.memory_space<vmem>>)
    %c1_i32 = arith.constant 1 : i32
    %c0_i32_6 = arith.constant 0 : i32
    %c0_i32_7 = arith.constant 0 : i32
    %9 = tpu.memref_slice %arg2[%c0_i32_6, %c0_i32_7] : memref<512x384xf32, #tpu.memory_space<any>> -> memref<1x384xf32, #tpu.memory_space<any>>
    %c1_i32_8 = arith.constant 1 : i32
    %c0_i32_9 = arith.constant 0 : i32
    %10 = tpu.memref_slice %arg9[%3, %c1_i32_8, %c0_i32_9] : memref<2x8x384xf32, #tpu.memory_space<vmem>> -> memref<1x1x384xf32, #tpu.memory_space<vmem>>
    %11 = tpu.memref_squeeze %10 : memref<1x1x384xf32, #tpu.memory_space<vmem>> -> memref<1x384xf32, #tpu.memory_space<vmem>>
    %12 = tpu.memref_slice %arg10[%3, %c1_i32] : memref<2x8x!tpu.dma_semaphore, #tpu.memory_space<semaphore_mem>> -> memref<1x1x!tpu.dma_semaphore, #tpu.memory_space<semaphore_mem>>
    %13 = tpu.memref_squeeze %12 : memref<1x1x!tpu.dma_semaphore, #tpu.memory_space<semaphore_mem>> -> memref<!tpu.dma_semaphore, #tpu.memory_space<semaphore_mem>>
    tpu.wait_dma2 semaphore(%13 : memref<!tpu.dma_semaphore, #tpu.memory_space<semaphore_mem>>) src(%9 : memref<1x384xf32, #tpu.memory_space<any>>) dst(%11 : memref<1x384xf32, #tpu.memory_space<vmem>>)
    %c2_i32_10 = arith.constant 2 : i32
    %c0_i32_11 = arith.constant 0 : i32
    %c0_i32_12 = arith.constant 0 : i32
    %14 = tpu.memref_slice %arg2[%c0_i32_11, %c0_i32_12] : memref<512x384xf32, #tpu.memory_space<any>> -> memref<1x384xf32, #tpu.memory_space<any>>
    %c2_i32_13 = arith.constant 2 : i32
    %c0_i32_14 = arith.constant 0 : i32
    %15 = tpu.memref_slice %arg9[%3, %c2_i32_13, %c0_i32_14] : memref<2x8x384xf32, #tpu.memory_space<vmem>> -> memref<1x1x384xf32, #tpu.memory_space<vmem>>
    %16 = tpu.memref_squeeze %15 : memref<1x1x384xf32, #tpu.memory_space<vmem>> -> memref<1x384xf32, #tpu.memory_space<vmem>>
    %17 = tpu.memref_slice %arg10[%3, %c2_i32_10] : memref<2x8x!tpu.dma_semaphore, #tpu.memory_space<semaphore_mem>> -> memref<1x1x!tpu.dma_semaphore, #tpu.memory_space<semaphore_mem>>
    %18 = tpu.memref_squeeze %17 : memref<1x1x!tpu.dma_semaphore, #tpu.memory_space<semaphore_mem>> -> memref<!tpu.dma_semaphore, #tpu.memory_space<semaphore_mem>>
    tpu.wait_dma2 semaphore(%18 : memref<!tpu.dma_semaphore, #tpu.memory_space<semaphore_mem>>) src(%14 : memref<1x384xf32, #tpu.memory_space<any>>) dst(%16 : memref<1x384xf32, #tpu.memory_space<vmem>>)
    %c3_i32 = arith.constant 3 : i32
    %c0_i32_15 = arith.constant 0 : i32
    %c0_i32_16 = arith.constant 0 : i32
    %19 = tpu.memref_slice %arg2[%c0_i32_15, %c0_i32_16] : memref<512x384xf32, #tpu.memory_space<any>> -> memref<1x384xf32, #tpu.memory_space<any>>
    %c3_i32_17 = arith.constant 3 : i32
    %c0_i32_18 = arith.constant 0 : i32
    %20 = tpu.memref_slice %arg9[%3, %c3_i32_17, %c0_i32_18] : memref<2x8x384xf32, #tpu.memory_space<vmem>> -> memref<1x1x384xf32, #tpu.memory_space<vmem>>
    %21 = tpu.memref_squeeze %20 : memref<1x1x384xf32, #tpu.memory_space<vmem>> -> memref<1x384xf32, #tpu.memory_space<vmem>>
    %22 = tpu.memref_slice %arg10[%3, %c3_i32] : memref<2x8x!tpu.dma_semaphore, #tpu.memory_space<semaphore_mem>> -> memref<1x1x!tpu.dma_semaphore, #tpu.memory_space<semaphore_mem>>
    %23 = tpu.memref_squeeze %22 : memref<1x1x!tpu.dma_semaphore, #tpu.memory_space<semaphore_mem>> -> memref<!tpu.dma_semaphore, #tpu.memory_space<semaphore_mem>>
    tpu.wait_dma2 semaphore(%23 : memref<!tpu.dma_semaphore, #tpu.memory_space<semaphore_mem>>) src(%19 : memref<1x384xf32, #tpu.memory_space<any>>) dst(%21 : memref<1x384xf32, #tpu.memory_space<vmem>>)
    %c4_i32 = arith.constant 4 : i32
    %c0_i32_19 = arith.constant 0 : i32
    %c0_i32_20 = arith.constant 0 : i32
    %24 = tpu.memref_slice %arg2[%c0_i32_19, %c0_i32_20] : memref<512x384xf32, #tpu.memory_space<any>> -> memref<1x384xf32, #tpu.memory_space<any>>
    %c4_i32_21 = arith.constant 4 : i32
    %c0_i32_22 = arith.constant 0 : i32
    %25 = tpu.memref_slice %arg9[%3, %c4_i32_21, %c0_i32_22] : memref<2x8x384xf32, #tpu.memory_space<vmem>> -> memref<1x1x384xf32, #tpu.memory_space<vmem>>
    %26 = tpu.memref_squeeze %25 : memref<1x1x384xf32, #tpu.memory_space<vmem>> -> memref<1x384xf32, #tpu.memory_space<vmem>>
    %27 = tpu.memref_slice %arg10[%3, %c4_i32] : memref<2x8x!tpu.dma_semaphore, #tpu.memory_space<semaphore_mem>> -> memref<1x1x!tpu.dma_semaphore, #tpu.memory_space<semaphore_mem>>
    %28 = tpu.memref_squeeze %27 : memref<1x1x!tpu.dma_semaphore, #tpu.memory_space<semaphore_mem>> -> memref<!tpu.dma_semaphore, #tpu.memory_space<semaphore_mem>>
    tpu.wait_dma2 semaphore(%28 : memref<!tpu.dma_semaphore, #tpu.memory_space<semaphore_mem>>) src(%24 : memref<1x384xf32, #tpu.memory_space<any>>) dst(%26 : memref<1x384xf32, #tpu.memory_space<vmem>>)
    %c5_i32 = arith.constant 5 : i32
    %c0_i32_23 = arith.constant 0 : i32
    %c0_i32_24 = arith.constant 0 : i32
    %29 = tpu.memref_slice %arg2[%c0_i32_23, %c0_i32_24] : memref<512x384xf32, #tpu.memory_space<any>> -> memref<1x384xf32, #tpu.memory_space<any>>
    %c5_i32_25 = arith.constant 5 : i32
    %c0_i32_26 = arith.constant 0 : i32
    %30 = tpu.memref_slice %arg9[%3, %c5_i32_25, %c0_i32_26] : memref<2x8x384xf32, #tpu.memory_space<vmem>> -> memref<1x1x384xf32, #tpu.memory_space<vmem>>
    %31 = tpu.memref_squeeze %30 : memref<1x1x384xf32, #tpu.memory_space<vmem>> -> memref<1x384xf32, #tpu.memory_space<vmem>>
    %32 = tpu.memref_slice %arg10[%3, %c5_i32] : memref<2x8x!tpu.dma_semaphore, #tpu.memory_space<semaphore_mem>> -> memref<1x1x!tpu.dma_semaphore, #tpu.memory_space<semaphore_mem>>
    %33 = tpu.memref_squeeze %32 : memref<1x1x!tpu.dma_semaphore, #tpu.memory_space<semaphore_mem>> -> memref<!tpu.dma_semaphore, #tpu.memory_space<semaphore_mem>>
    tpu.wait_dma2 semaphore(%33 : memref<!tpu.dma_semaphore, #tpu.memory_space<semaphore_mem>>) src(%29 : memref<1x384xf32, #tpu.memory_space<any>>) dst(%31 : memref<1x384xf32, #tpu.memory_space<vmem>>)
    %c6_i32 = arith.constant 6 : i32
    %c0_i32_27 = arith.constant 0 : i32
    %c0_i32_28 = arith.constant 0 : i32
    %34 = tpu.memref_slice %arg2[%c0_i32_27, %c0_i32_28] : memref<512x384xf32, #tpu.memory_space<any>> -> memref<1x384xf32, #tpu.memory_space<any>>
    %c6_i32_29 = arith.constant 6 : i32
    %c0_i32_30 = arith.constant 0 : i32
    %35 = tpu.memref_slice %arg9[%3, %c6_i32_29, %c0_i32_30] : memref<2x8x384xf32, #tpu.memory_space<vmem>> -> memref<1x1x384xf32, #tpu.memory_space<vmem>>
    %36 = tpu.memref_squeeze %35 : memref<1x1x384xf32, #tpu.memory_space<vmem>> -> memref<1x384xf32, #tpu.memory_space<vmem>>
    %37 = tpu.memref_slice %arg10[%3, %c6_i32] : memref<2x8x!tpu.dma_semaphore, #tpu.memory_space<semaphore_mem>> -> memref<1x1x!tpu.dma_semaphore, #tpu.memory_space<semaphore_mem>>
    %38 = tpu.memref_squeeze %37 : memref<1x1x!tpu.dma_semaphore, #tpu.memory_space<semaphore_mem>> -> memref<!tpu.dma_semaphore, #tpu.memory_space<semaphore_mem>>
    tpu.wait_dma2 semaphore(%38 : memref<!tpu.dma_semaphore, #tpu.memory_space<semaphore_mem>>) src(%34 : memref<1x384xf32, #tpu.memory_space<any>>) dst(%36 : memref<1x384xf32, #tpu.memory_space<vmem>>)
    %c7_i32 = arith.constant 7 : i32
    %c0_i32_31 = arith.constant 0 : i32
    %c0_i32_32 = arith.constant 0 : i32
    %39 = tpu.memref_slice %arg2[%c0_i32_31, %c0_i32_32] : memref<512x384xf32, #tpu.memory_space<any>> -> memref<1x384xf32, #tpu.memory_space<any>>
    %c7_i32_33 = arith.constant 7 : i32
    %c0_i32_34 = arith.constant 0 : i32
    %40 = tpu.memref_slice %arg9[%3, %c7_i32_33, %c0_i32_34] : memref<2x8x384xf32, #tpu.memory_space<vmem>> -> memref<1x1x384xf32, #tpu.memory_space<vmem>>
    %41 = tpu.memref_squeeze %40 : memref<1x1x384xf32, #tpu.memory_space<vmem>> -> memref<1x384xf32, #tpu.memory_space<vmem>>
    %42 = tpu.memref_slice %arg10[%3, %c7_i32] : memref<2x8x!tpu.dma_semaphore, #tpu.memory_space<semaphore_mem>> -> memref<1x1x!tpu.dma_semaphore, #tpu.memory_space<semaphore_mem>>
    %43 = tpu.memref_squeeze %42 : memref<1x1x!tpu.dma_semaphore, #tpu.memory_space<semaphore_mem>> -> memref<!tpu.dma_semaphore, #tpu.memory_space<semaphore_mem>>
    tpu.wait_dma2 semaphore(%43 : memref<!tpu.dma_semaphore, #tpu.memory_space<semaphore_mem>>) src(%39 : memref<1x384xf32, #tpu.memory_space<any>>) dst(%41 : memref<1x384xf32, #tpu.memory_space<vmem>>)
    %c1_i32_35 = arith.constant 1 : i32
    %44 = arith.addi %arg0, %c1_i32_35 : i32
    %c6_i32_36 = arith.constant 6 : i32
    %45 = arith.cmpi slt, %44, %c6_i32_36 : i32
    %46 = arith.extui %45 : i1 to i32
    %c0_i32_37 = arith.constant 0 : i32
    %47 = arith.cmpi ne, %46, %c0_i32_37 : i32
    scf.if %47 {
      %c1_i32_57 = arith.constant 1 : i32
      %91 = arith.addi %arg0, %c1_i32_57 : i32
      %c1_i32_58 = arith.constant 1 : i32
      %92 = arith.subi %c1_i32_58, %3 : i32
      %93 = arith.index_cast %91 : i32 to index
      %c0_59 = arith.constant 0 : index
      %94 = memref.load %arg1[%93, %c0_59] : memref<6x8xi32, #tpu.memory_space<smem>>
      %c0_i32_60 = arith.constant 0 : i32
      %95 = arith.maxsi %94, %c0_i32_60 : i32
      %c511_i32 = arith.constant 511 : i32
      %96 = arith.minsi %95, %c511_i32 : i32
      %c0_i32_61 = arith.constant 0 : i32
      %c0_i32_62 = arith.constant 0 : i32
      %97 = tpu.memref_slice %arg2[%96, %c0_i32_62] : memref<512x384xf32, #tpu.memory_space<any>> -> memref<1x384xf32, #tpu.memory_space<any>>
      %c0_i32_63 = arith.constant 0 : i32
      %c0_i32_64 = arith.constant 0 : i32
      %98 = tpu.memref_slice %arg9[%92, %c0_i32_63, %c0_i32_64] : memref<2x8x384xf32, #tpu.memory_space<vmem>> -> memref<1x1x384xf32, #tpu.memory_space<vmem>>
      %99 = tpu.memref_squeeze %98 : memref<1x1x384xf32, #tpu.memory_space<vmem>> -> memref<1x384xf32, #tpu.memory_space<vmem>>
      %100 = tpu.memref_slice %arg10[%92, %c0_i32_61] : memref<2x8x!tpu.dma_semaphore, #tpu.memory_space<semaphore_mem>> -> memref<1x1x!tpu.dma_semaphore, #tpu.memory_space<semaphore_mem>>
      %101 = tpu.memref_squeeze %100 : memref<1x1x!tpu.dma_semaphore, #tpu.memory_space<semaphore_mem>> -> memref<!tpu.dma_semaphore, #tpu.memory_space<semaphore_mem>>
      tpu.enqueue_dma source(%97 : memref<1x384xf32, #tpu.memory_space<any>>) target(%99 : memref<1x384xf32, #tpu.memory_space<vmem>>) target_semaphore(%101 : memref<!tpu.dma_semaphore, #tpu.memory_space<semaphore_mem>>)
      %102 = arith.index_cast %91 : i32 to index
      %c1 = arith.constant 1 : index
      %103 = memref.load %arg1[%102, %c1] : memref<6x8xi32, #tpu.memory_space<smem>>
      %c0_i32_65 = arith.constant 0 : i32
      %104 = arith.maxsi %103, %c0_i32_65 : i32
      %c511_i32_66 = arith.constant 511 : i32
      %105 = arith.minsi %104, %c511_i32_66 : i32
      %c1_i32_67 = arith.constant 1 : i32
      %c0_i32_68 = arith.constant 0 : i32
      %106 = tpu.memref_slice %arg2[%105, %c0_i32_68] : memref<512x384xf32, #tpu.memory_space<any>> -> memref<1x384xf32, #tpu.memory_space<any>>
      %c1_i32_69 = arith.constant 1 : i32
      %c0_i32_70 = arith.constant 0 : i32
      %107 = tpu.memref_slice %arg9[%92, %c1_i32_69, %c0_i32_70] : memref<2x8x384xf32, #tpu.memory_space<vmem>> -> memref<1x1x384xf32, #tpu.memory_space<vmem>>
      %108 = tpu.memref_squeeze %107 : memref<1x1x384xf32, #tpu.memory_space<vmem>> -> memref<1x384xf32, #tpu.memory_space<vmem>>
      %109 = tpu.memref_slice %arg10[%92, %c1_i32_67] : memref<2x8x!tpu.dma_semaphore, #tpu.memory_space<semaphore_mem>> -> memref<1x1x!tpu.dma_semaphore, #tpu.memory_space<semaphore_mem>>
      %110 = tpu.memref_squeeze %109 : memref<1x1x!tpu.dma_semaphore, #tpu.memory_space<semaphore_mem>> -> memref<!tpu.dma_semaphore, #tpu.memory_space<semaphore_mem>>
      tpu.enqueue_dma source(%106 : memref<1x384xf32, #tpu.memory_space<any>>) target(%108 : memref<1x384xf32, #tpu.memory_space<vmem>>) target_semaphore(%110 : memref<!tpu.dma_semaphore, #tpu.memory_space<semaphore_mem>>)
      %111 = arith.index_cast %91 : i32 to index
      %c2 = arith.constant 2 : index
      %112 = memref.load %arg1[%111, %c2] : memref<6x8xi32, #tpu.memory_space<smem>>
      %c0_i32_71 = arith.constant 0 : i32
      %113 = arith.maxsi %112, %c0_i32_71 : i32
      %c511_i32_72 = arith.constant 511 : i32
      %114 = arith.minsi %113, %c511_i32_72 : i32
      %c2_i32_73 = arith.constant 2 : i32
      %c0_i32_74 = arith.constant 0 : i32
      %115 = tpu.memref_slice %arg2[%114, %c0_i32_74] : memref<512x384xf32, #tpu.memory_space<any>> -> memref<1x384xf32, #tpu.memory_space<any>>
      %c2_i32_75 = arith.constant 2 : i32
      %c0_i32_76 = arith.constant 0 : i32
      %116 = tpu.memref_slice %arg9[%92, %c2_i32_75, %c0_i32_76] : memref<2x8x384xf32, #tpu.memory_space<vmem>> -> memref<1x1x384xf32, #tpu.memory_space<vmem>>
      %117 = tpu.memref_squeeze %116 : memref<1x1x384xf32, #tpu.memory_space<vmem>> -> memref<1x384xf32, #tpu.memory_space<vmem>>
      %118 = tpu.memref_slice %arg10[%92, %c2_i32_73] : memref<2x8x!tpu.dma_semaphore, #tpu.memory_space<semaphore_mem>> -> memref<1x1x!tpu.dma_semaphore, #tpu.memory_space<semaphore_mem>>
      %119 = tpu.memref_squeeze %118 : memref<1x1x!tpu.dma_semaphore, #tpu.memory_space<semaphore_mem>> -> memref<!tpu.dma_semaphore, #tpu.memory_space<semaphore_mem>>
      tpu.enqueue_dma source(%115 : memref<1x384xf32, #tpu.memory_space<any>>) target(%117 : memref<1x384xf32, #tpu.memory_space<vmem>>) target_semaphore(%119 : memref<!tpu.dma_semaphore, #tpu.memory_space<semaphore_mem>>)
      %120 = arith.index_cast %91 : i32 to index
      %c3 = arith.constant 3 : index
      %121 = memref.load %arg1[%120, %c3] : memref<6x8xi32, #tpu.memory_space<smem>>
      %c0_i32_77 = arith.constant 0 : i32
      %122 = arith.maxsi %121, %c0_i32_77 : i32
      %c511_i32_78 = arith.constant 511 : i32
      %123 = arith.minsi %122, %c511_i32_78 : i32
      %c3_i32_79 = arith.constant 3 : i32
      %c0_i32_80 = arith.constant 0 : i32
      %124 = tpu.memref_slice %arg2[%123, %c0_i32_80] : memref<512x384xf32, #tpu.memory_space<any>> -> memref<1x384xf32, #tpu.memory_space<any>>
      %c3_i32_81 = arith.constant 3 : i32
      %c0_i32_82 = arith.constant 0 : i32
      %125 = tpu.memref_slice %arg9[%92, %c3_i32_81, %c0_i32_82] : memref<2x8x384xf32, #tpu.memory_space<vmem>> -> memref<1x1x384xf32, #tpu.memory_space<vmem>>
      %126 = tpu.memref_squeeze %125 : memref<1x1x384xf32, #tpu.memory_space<vmem>> -> memref<1x384xf32, #tpu.memory_space<vmem>>
      %127 = tpu.memref_slice %arg10[%92, %c3_i32_79] : memref<2x8x!tpu.dma_semaphore, #tpu.memory_space<semaphore_mem>> -> memref<1x1x!tpu.dma_semaphore, #tpu.memory_space<semaphore_mem>>
      %128 = tpu.memref_squeeze %127 : memref<1x1x!tpu.dma_semaphore, #tpu.memory_space<semaphore_mem>> -> memref<!tpu.dma_semaphore, #tpu.memory_space<semaphore_mem>>
      tpu.enqueue_dma source(%124 : memref<1x384xf32, #tpu.memory_space<any>>) target(%126 : memref<1x384xf32, #tpu.memory_space<vmem>>) target_semaphore(%128 : memref<!tpu.dma_semaphore, #tpu.memory_space<semaphore_mem>>)
      %129 = arith.index_cast %91 : i32 to index
      %c4 = arith.constant 4 : index
      %130 = memref.load %arg1[%129, %c4] : memref<6x8xi32, #tpu.memory_space<smem>>
      %c0_i32_83 = arith.constant 0 : i32
      %131 = arith.maxsi %130, %c0_i32_83 : i32
      %c511_i32_84 = arith.constant 511 : i32
      %132 = arith.minsi %131, %c511_i32_84 : i32
      %c4_i32_85 = arith.constant 4 : i32
      %c0_i32_86 = arith.constant 0 : i32
      %133 = tpu.memref_slice %arg2[%132, %c0_i32_86] : memref<512x384xf32, #tpu.memory_space<any>> -> memref<1x384xf32, #tpu.memory_space<any>>
      %c4_i32_87 = arith.constant 4 : i32
      %c0_i32_88 = arith.constant 0 : i32
      %134 = tpu.memref_slice %arg9[%92, %c4_i32_87, %c0_i32_88] : memref<2x8x384xf32, #tpu.memory_space<vmem>> -> memref<1x1x384xf32, #tpu.memory_space<vmem>>
      %135 = tpu.memref_squeeze %134 : memref<1x1x384xf32, #tpu.memory_space<vmem>> -> memref<1x384xf32, #tpu.memory_space<vmem>>
      %136 = tpu.memref_slice %arg10[%92, %c4_i32_85] : memref<2x8x!tpu.dma_semaphore, #tpu.memory_space<semaphore_mem>> -> memref<1x1x!tpu.dma_semaphore, #tpu.memory_space<semaphore_mem>>
      %137 = tpu.memref_squeeze %136 : memref<1x1x!tpu.dma_semaphore, #tpu.memory_space<semaphore_mem>> -> memref<!tpu.dma_semaphore, #tpu.memory_space<semaphore_mem>>
      tpu.enqueue_dma source(%133 : memref<1x384xf32, #tpu.memory_space<any>>) target(%135 : memref<1x384xf32, #tpu.memory_space<vmem>>) target_semaphore(%137 : memref<!tpu.dma_semaphore, #tpu.memory_space<semaphore_mem>>)
      %138 = arith.index_cast %91 : i32 to index
      %c5 = arith.constant 5 : index
      %139 = memref.load %arg1[%138, %c5] : memref<6x8xi32, #tpu.memory_space<smem>>
      %c0_i32_89 = arith.constant 0 : i32
      %140 = arith.maxsi %139, %c0_i32_89 : i32
      %c511_i32_90 = arith.constant 511 : i32
      %141 = arith.minsi %140, %c511_i32_90 : i32
      %c5_i32_91 = arith.constant 5 : i32
      %c0_i32_92 = arith.constant 0 : i32
      %142 = tpu.memref_slice %arg2[%141, %c0_i32_92] : memref<512x384xf32, #tpu.memory_space<any>> -> memref<1x384xf32, #tpu.memory_space<any>>
      %c5_i32_93 = arith.constant 5 : i32
      %c0_i32_94 = arith.constant 0 : i32
      %143 = tpu.memref_slice %arg9[%92, %c5_i32_93, %c0_i32_94] : memref<2x8x384xf32, #tpu.memory_space<vmem>> -> memref<1x1x384xf32, #tpu.memory_space<vmem>>
      %144 = tpu.memref_squeeze %143 : memref<1x1x384xf32, #tpu.memory_space<vmem>> -> memref<1x384xf32, #tpu.memory_space<vmem>>
      %145 = tpu.memref_slice %arg10[%92, %c5_i32_91] : memref<2x8x!tpu.dma_semaphore, #tpu.memory_space<semaphore_mem>> -> memref<1x1x!tpu.dma_semaphore, #tpu.memory_space<semaphore_mem>>
      %146 = tpu.memref_squeeze %145 : memref<1x1x!tpu.dma_semaphore, #tpu.memory_space<semaphore_mem>> -> memref<!tpu.dma_semaphore, #tpu.memory_space<semaphore_mem>>
      tpu.enqueue_dma source(%142 : memref<1x384xf32, #tpu.memory_space<any>>) target(%144 : memref<1x384xf32, #tpu.memory_space<vmem>>) target_semaphore(%146 : memref<!tpu.dma_semaphore, #tpu.memory_space<semaphore_mem>>)
      %147 = arith.index_cast %91 : i32 to index
      %c6 = arith.constant 6 : index
      %148 = memref.load %arg1[%147, %c6] : memref<6x8xi32, #tpu.memory_space<smem>>
      %c0_i32_95 = arith.constant 0 : i32
      %149 = arith.maxsi %148, %c0_i32_95 : i32
      %c511_i32_96 = arith.constant 511 : i32
      %150 = arith.minsi %149, %c511_i32_96 : i32
      %c6_i32_97 = arith.constant 6 : i32
      %c0_i32_98 = arith.constant 0 : i32
      %151 = tpu.memref_slice %arg2[%150, %c0_i32_98] : memref<512x384xf32, #tpu.memory_space<any>> -> memref<1x384xf32, #tpu.memory_space<any>>
      %c6_i32_99 = arith.constant 6 : i32
      %c0_i32_100 = arith.constant 0 : i32
      %152 = tpu.memref_slice %arg9[%92, %c6_i32_99, %c0_i32_100] : memref<2x8x384xf32, #tpu.memory_space<vmem>> -> memref<1x1x384xf32, #tpu.memory_space<vmem>>
      %153 = tpu.memref_squeeze %152 : memref<1x1x384xf32, #tpu.memory_space<vmem>> -> memref<1x384xf32, #tpu.memory_space<vmem>>
      %154 = tpu.memref_slice %arg10[%92, %c6_i32_97] : memref<2x8x!tpu.dma_semaphore, #tpu.memory_space<semaphore_mem>> -> memref<1x1x!tpu.dma_semaphore, #tpu.memory_space<semaphore_mem>>
      %155 = tpu.memref_squeeze %154 : memref<1x1x!tpu.dma_semaphore, #tpu.memory_space<semaphore_mem>> -> memref<!tpu.dma_semaphore, #tpu.memory_space<semaphore_mem>>
      tpu.enqueue_dma source(%151 : memref<1x384xf32, #tpu.memory_space<any>>) target(%153 : memref<1x384xf32, #tpu.memory_space<vmem>>) target_semaphore(%155 : memref<!tpu.dma_semaphore, #tpu.memory_space<semaphore_mem>>)
      %156 = arith.index_cast %91 : i32 to index
      %c7 = arith.constant 7 : index
      %157 = memref.load %arg1[%156, %c7] : memref<6x8xi32, #tpu.memory_space<smem>>
      %c0_i32_101 = arith.constant 0 : i32
      %158 = arith.maxsi %157, %c0_i32_101 : i32
      %c511_i32_102 = arith.constant 511 : i32
      %159 = arith.minsi %158, %c511_i32_102 : i32
      %c7_i32_103 = arith.constant 7 : i32
      %c0_i32_104 = arith.constant 0 : i32
      %160 = tpu.memref_slice %arg2[%159, %c0_i32_104] : memref<512x384xf32, #tpu.memory_space<any>> -> memref<1x384xf32, #tpu.memory_space<any>>
      %c7_i32_105 = arith.constant 7 : i32
      %c0_i32_106 = arith.constant 0 : i32
      %161 = tpu.memref_slice %arg9[%92, %c7_i32_105, %c0_i32_106] : memref<2x8x384xf32, #tpu.memory_space<vmem>> -> memref<1x1x384xf32, #tpu.memory_space<vmem>>
      %162 = tpu.memref_squeeze %161 : memref<1x1x384xf32, #tpu.memory_space<vmem>> -> memref<1x384xf32, #tpu.memory_space<vmem>>
      %163 = tpu.memref_slice %arg10[%92, %c7_i32_103] : memref<2x8x!tpu.dma_semaphore, #tpu.memory_space<semaphore_mem>> -> memref<1x1x!tpu.dma_semaphore, #tpu.memory_space<semaphore_mem>>
      %164 = tpu.memref_squeeze %163 : memref<1x1x!tpu.dma_semaphore, #tpu.memory_space<semaphore_mem>> -> memref<!tpu.dma_semaphore, #tpu.memory_space<semaphore_mem>>
      tpu.enqueue_dma source(%160 : memref<1x384xf32, #tpu.memory_space<any>>) target(%162 : memref<1x384xf32, #tpu.memory_space<vmem>>) target_semaphore(%164 : memref<!tpu.dma_semaphore, #tpu.memory_space<semaphore_mem>>)
    } else {
    }
    %c0 = arith.constant 0 : index
    %c0_38 = arith.constant 0 : index
    %48 = vector.load %arg11[%c0, %c0_38] : memref<8x128xf32, #tpu.memory_space<vmem>>, vector<8x128xf32>
    %c0_39 = arith.constant 0 : index
    %c0_40 = arith.constant 0 : index
    %49 = vector.load %arg4[%c0_39, %c0_40] : memref<128x384xf32, #tpu.memory_space<vmem>>, vector<128x384xf32>
    %cst = arith.constant dense<0.000000e+00> : vector<8x384xf32>
    %50 = tpu.matmul %48, %49, %cst {dimension_numbers = #tpu.dot_dimension_numbers<[1], [0], [0], [1], [0, 0, 1, 1], [], []>} : vector<8x128xf32>, vector<128x384xf32>, vector<8x384xf32> -> vector<8x384xf32>
    %c0_41 = arith.constant 0 : index
    %c0_42 = arith.constant 0 : index
    %51 = vector.load %arg6[%c0_41, %c0_42] : memref<1x384xf32, #tpu.memory_space<vmem>>, vector<1x384xf32>
    %52 = vector.broadcast %51 : vector<1x384xf32> to vector<8x384xf32>
    %53 = arith.addf %50, %52 : vector<8x384xf32>
    %54 = arith.index_cast %3 : i32 to index
    %c0_43 = arith.constant 0 : index
    %c0_44 = arith.constant 0 : index
    %55 = vector.load %arg9[%54, %c0_43, %c0_44] : memref<2x8x384xf32, #tpu.memory_space<vmem>>, vector<1x8x384xf32>
    %56 = vector.shape_cast %55 : vector<1x8x384xf32> to vector<8x384xf32>
    %57 = arith.truncf %56 : vector<8x384xf32> to vector<8x384xbf16>
    %c0_45 = arith.constant 0 : index
    %c0_46 = arith.constant 0 : index
    %58 = vector.load %arg3[%c0_45, %c0_46] : memref<384x384xbf16, #tpu.memory_space<vmem>>, vector<384x384xbf16>
    %cst_47 = arith.constant dense<0.000000e+00> : vector<8x384xf32>
    %59 = tpu.matmul %57, %58, %cst_47 {dimension_numbers = #tpu.dot_dimension_numbers<[1], [0], [0], [1], [0, 0, 1, 1], [], []>} : vector<8x384xbf16>, vector<384x384xbf16>, vector<8x384xf32> -> vector<8x384xf32>
    %c0_48 = arith.constant 0 : index
    %c0_49 = arith.constant 0 : index
    %60 = vector.load %arg5[%c0_48, %c0_49] : memref<1x384xf32, #tpu.memory_space<vmem>>, vector<1x384xf32>
    %61 = vector.broadcast %60 : vector<1x384xf32> to vector<8x384xf32>
    %62 = arith.addf %59, %61 : vector<8x384xf32>
    %63 = vector.extract_strided_slice %62 {offsets = [0, 0], sizes = [8, 128], strides = [1, 1]} : vector<8x384xf32> to vector<8x128xf32>
    %64 = vector.extract_strided_slice %62 {offsets = [0, 128], sizes = [8, 128], strides = [1, 1]} : vector<8x384xf32> to vector<8x128xf32>
    %65 = vector.extract_strided_slice %62 {offsets = [0, 256], sizes = [8, 128], strides = [1, 1]} : vector<8x384xf32> to vector<8x128xf32>
    %66 = vector.extract_strided_slice %53 {offsets = [0, 0], sizes = [8, 128], strides = [1, 1]} : vector<8x384xf32> to vector<8x128xf32>
    %67 = vector.extract_strided_slice %53 {offsets = [0, 128], sizes = [8, 128], strides = [1, 1]} : vector<8x384xf32> to vector<8x128xf32>
    %68 = vector.extract_strided_slice %53 {offsets = [0, 256], sizes = [8, 128], strides = [1, 1]} : vector<8x384xf32> to vector<8x128xf32>
    %69 = arith.addf %63, %66 : vector<8x128xf32>
    %70 = arith.negf %69 : vector<8x128xf32>
    %71 = math.exp %70 : vector<8x128xf32>
    %cst_50 = arith.constant 1.000000e+00 : f32
    %72 = vector.broadcast %cst_50 : f32 to vector<8x128xf32>
    %73 = arith.addf %72, %71 : vector<8x128xf32>
    %74 = arith.divf %72, %73 : vector<8x128xf32>
    %75 = arith.addf %64, %67 : vector<8x128xf32>
    %76 = arith.negf %75 : vector<8x128xf32>
    %77 = math.exp %76 : vector<8x128xf32>
    %cst_51 = arith.constant 1.000000e+00 : f32
    %78 = vector.broadcast %cst_51 : f32 to vector<8x128xf32>
    %79 = arith.addf %78, %77 : vector<8x128xf32>
    %80 = arith.divf %78, %79 : vector<8x128xf32>
    %81 = arith.mulf %74, %68 : vector<8x128xf32>
    %82 = arith.addf %65, %81 : vector<8x128xf32>
    %83 = math.tanh %82 : vector<8x128xf32>
    %84 = arith.subf %48, %83 : vector<8x128xf32>
    %85 = arith.mulf %80, %84 : vector<8x128xf32>
    %86 = arith.addf %83, %85 : vector<8x128xf32>
    %c0_52 = arith.constant 0 : index
    %c0_53 = arith.constant 0 : index
    %87 = vector.load %arg11[%c0_52, %c0_53] : memref<8x128xf32, #tpu.memory_space<vmem>>, vector<8x128xf32>
    tpu.vector_store %arg11[%c0_52, %c0_53], %86 {strides = array<i32>} : memref<8x128xf32, #tpu.memory_space<vmem>>, vector<8x128xf32>,
    %c0_54 = arith.constant 0 : index
    %c0_55 = arith.constant 0 : index
    %c0_56 = arith.constant 0 : index
    %88 = vector.load %arg8[%c0_54, %c0_55, %c0_56] : memref<1x8x128xf32, #tpu.memory_space<vmem>>, vector<1x8x128xf32>
    %89 = vector.shape_cast %88 : vector<1x8x128xf32> to vector<8x128xf32>
    %90 = vector.shape_cast %86 : vector<8x128xf32> to vector<1x8x128xf32>
    tpu.vector_store %arg8[%c0_54, %c0_55, %c0_56], %90 {strides = array<i32>} : memref<1x8x128xf32, #tpu.memory_space<vmem>>, vector<1x8x128xf32>,
    return
  }
  func.func @transform_1(%arg0: i32, %arg1: memref<6x8xi32, #tpu.memory_space<smem>>) -> (i32, i32) {
    %c0_i32 = arith.constant 0 : i32
    %c0_i32_0 = arith.constant 0 : i32
    %c0_i32_1 = arith.constant 0 : i32
    return %c0_i32, %c0_i32_0 : i32, i32
  }
  func.func @transform_2(%arg0: i32, %arg1: memref<6x8xi32, #tpu.memory_space<smem>>) -> (i32, i32) {
    %c0_i32 = arith.constant 0 : i32
    %c0_i32_0 = arith.constant 0 : i32
    %c0_i32_1 = arith.constant 0 : i32
    return %c0_i32, %c0_i32_0 : i32, i32
  }
  func.func @transform_3(%arg0: i32, %arg1: memref<6x8xi32, #tpu.memory_space<smem>>) -> (i32, i32) {
    %c0_i32 = arith.constant 0 : i32
    %c0_i32_0 = arith.constant 0 : i32
    %c0_i32_1 = arith.constant 0 : i32
    return %c0_i32, %c0_i32_0 : i32, i32
  }
  func.func @transform_4(%arg0: i32, %arg1: memref<6x8xi32, #tpu.memory_space<smem>>) -> (i32, i32) {
    %c0_i32 = arith.constant 0 : i32
    %c0_i32_0 = arith.constant 0 : i32
    %c0_i32_1 = arith.constant 0 : i32
    return %c0_i32, %c0_i32_0 : i32, i32
  }
  func.func @transform_5(%arg0: i32, %arg1: memref<6x8xi32, #tpu.memory_space<smem>>) -> (i32, i32, i32) {
    %c0_i32 = arith.constant 0 : i32
    %c0_i32_0 = arith.constant 0 : i32
    %c0_i32_1 = arith.constant 0 : i32
    %c0_i32_2 = arith.constant 0 : i32
    return %c0_i32, %c0_i32_0, %c0_i32_1 : i32, i32, i32
  }
  func.func @transform_6(%arg0: i32, %arg1: memref<6x8xi32, #tpu.memory_space<smem>>) -> (i32, i32, i32) {
    %c0_i32 = arith.constant 0 : i32
    %c0_i32_0 = arith.constant 0 : i32
    %c0_i32_1 = arith.constant 0 : i32
    return %arg0, %c0_i32, %c0_i32_0 : i32, i32, i32
  }
}

</mosaic_0001>

<bundles_post_ra>
// kernel: tpu_custom_call.1
= control target key start
LH: loop header
LB: loop body
LE: loop exit
PB: predicated region body
PF: predicated region fallthrough
CT: control target
= control target key end

     0   :  { %s3704_s0 = inlined_call_operand.hbm [shape: s32[6,8], index: 0, kind: input, shape index: {}]   ;;  %s3705_s1 = inlined_call_operand.hbm [shape: f32[512,384], index: 1, kind: input, shape index: {}]   ;;  %s3706_s2 = inlined_call_operand.hbm [shape: bf16[384,384], index: 2, kind: input, shape index: {}]   ;;  %s3707_s3 = inlined_call_operand.hbm [shape: f32[128,384], index: 3, kind: input, shape index: {}]   ;;  %s3708_s4 = inlined_call_operand.vmem [shape: f32[1,384], index: 4, kind: input, shape index: {}]   ;;  %s3709_s5 = inlined_call_operand.vmem [shape: f32[1,384], index: 5, kind: input, shape index: {}]   ;;  %s3710_s6 = inlined_call_operand.vmem [shape: f32[1,8,128], index: 6, kind: input, shape index: {}]   ;;  %s3711_s7 = inlined_call_operand.hbm [shape: f32[6,8,128], index: 7, kind: output, shape index: {}]  }
   0x1   :  { %3733 = sst [smem:[#allocation51_spill]] %s3706_s2  ;;  %s2440_s26 = scalar_lea.hbm %s3704_s0, 128 }
   0x2   :  { %3734 = sst [smem:[#allocation52_spill]] %s3707_s3  ;;  %p2441_p0 = scmp.ne.s32.totalorder %s3704_s0, %s2440_s26 }
   0x3   :  { %3735 = sst [smem:[#allocation53_spill]] %s3709_s5  ;;  %p2444_p1 = scmp.lt.u32.totalorder %s2440_s26, %s3704_s0 }
   0x4   :  { %3736 = sst [smem:[#allocation54_spill]] %s3710_s6 }
   0x5   :  { %3737 = sst [smem:[#allocation55_spill]] %s3711_s7  ;;  %p2446_p2 = pnand %p2444_p1, %p2441_p0 }
   0x7   :  { %2449 = shalt.err (!%p2446_p2)  }
   0x8   :  { %s2980_s8 = smov [#allocation6]  }
   0x9   :  { %13 = dma.hbm_to_smem %s3704_s0, 128, %s2980_s8, [#allocation5] }
   0xa   :  { %2934 = dma.done.wait [#allocation5], 128 }
   0xb   :  { %2935 = vsyncadd [#allocation5], 4294967168 }
   0xc   :  { %15 = sfence }
   0xd   :  { %16 = vsyncpa [#allocation8], 0 }
   0xe   :  { %17 = vsyncpa [#allocation11], 0 }
   0xf   :  { %18 = vsyncpa [#allocation9], 0 }
  0x10   :  { %20 = vsyncpa [#allocation9 + $0x1], 0  ;;  %s3057_s11 = smov 0   ;;  %s3059_s12 = smov 0  }
  0x11   :  { %s3061_s13 = smov 0   ;;  %s3063_s14 = smov 0  }
  0x12 LB: > { %3738 = sst [smem:[#allocation41_spill]] %s2966_s11  ;;  %s3078_s0 = sadd.s32 4294967295, %s2978_s14   ;;  %s2978_s14 = sphi %s3063_s14, %s3781_s14   ;;  %s2974_s13 = sphi %s3061_s13, %s3784_s13   ;;  %s2970_s12 = sphi %s3059_s12, %s3783_s12   ;;  %s2966_s11 = sphi %s3057_s11, %s3782_s11  }
  0x13   : > { %3739 = sst [smem:[#allocation42_spill]] %s2970_s12  ;;  %s1827_s15 = sadd.s32 4294967294, %s2978_s14  }
  0x14   : > { %3740 = sst [smem:[#allocation43_spill]] %s2974_s13  ;;  %s3082_s16 = sadd.s32 1, %s2978_s14  }
  0x15   : > { %3741 = sst [smem:[#allocation44_spill]] %s2978_s14  ;;  %s138_s17 = sadd.s32 1, %s2974_s13 }
  0x16   : > { %3742 = sst [smem:[#allocation45_spill]] %s3078_s0  ;;  %s135_s18 = ssub.s32 %s2978_s14, %s3082_s16 }
  0x17   : > { %3743 = sst [smem:[#allocation46_spill]] %s3082_s16  ;;  %p148_p3 = scmp.ne.s32.totalorder %s2974_s13, %s2970_s12 }
  0x18   : > { %p136_p4 = scmp.eq.s32.totalorder %s135_s18, 0  ;;  %p149_p5 = scmp.eq.s32.totalorder %s3078_s0, 5 }
  0x19   : > { %p154_p6 = scmp.ne.s32.totalorder %s2970_s12, %s2966_s11  ;;  %p155_p7 = scmp.eq.s32.totalorder %s1827_s15, 5 }
  0x1a   : > { %s3093_s19 = scalar_select %p136_p4, %s2974_s13, %s138_s17  }
  0x1b   : > { %p3095_p8 = por %p149_p5, %p148_p3  ;;  %p3099_p9 = por %p155_p7, %p154_p6 }
  0x1c   : > { %3744 = sst [smem:[#allocation47_spill]] %s3093_s19  ;;  %p1828_p10 = scmp.ge.s32.totalorder %s2978_s14, 1 }
  0x1d   : > { %s3745_s20 = scalar_select %p3095_p8, 1, 0 }
  0x1e   : > { %s3747_s21 = scalar_select %p3099_p9, 1, 0 }
  0x1f   : > { %3746 = sst [smem:[#allocation48_spill]] %s3745_s20  ;;  %p162_p11 = scmp.lt.s32.totalorder %s2978_s14, 7 }
  0x20   : > { %3748 = sst [smem:[#allocation49_spill]] %s3747_s21  ;;  %p3712_p13 = scmp.eq.s32.totalorder %s3078_s0, 0 }
  0x21   : > { %p3107_p0 = pnand %p1828_p10, %p162_p11  ;;  %s2981_s23 = smov [#allocation7]  }
  0x22   : > { %s174_s24 = sshll.u32 %s2981_s23, 4  ;;  %s2982_s26 = smov [#allocation10]   ;;  %s175_s24 = int_to_ptr.vmem [resolvable:$true] %s174_s24 }
  0x23   : > { %s3749_s22 = scalar_select %p3107_p0, 1, 0 }
  0x24   : > { %p2263_p1 = pneg %p3107_p0  ;;  %s187_s27 = sshll.u32 %s2982_s26, 4  ;;  %s3119_s27 = int_to_ptr.vmem [resolvable:$true] %s187_s27 }
  0x25   : > { %s3751_s2 = sld [smem:[#allocation51_spill]] }
  0x26   : > { %p3115_p2 = pnand %p3712_p13, %p2263_p1 }
  0x28   : > { %p2452_p4 = pneg %p3115_p2 }
  0x2b   : > { %s2450_s30 = scalar_lea.hbm %s3751_s2, 9216 }
  0x2c   : > { %p2451_p3 = scmp.ne.s32.totalorder %s3751_s2, %s2450_s30  ;;  %p2457_p7 = scmp.lt.u32.totalorder %s2450_s30, %s3751_s2 }
  0x2e   : > { %p2453_p5 = pnand %p2452_p4, %p2451_p3 }
  0x30   : > { %p2454_p6 = pneg %p2453_p5 }
  0x32   : > { %p2459_p10 = pnand %p2457_p7, %p2454_p6 }
  0x34   : > { %2462 = shalt.err (!%p2459_p10)
}
  0x35   : > { %s2463_s17 = scalar_lea.vmem %s175_s24, 9216  ;;  %p2471_p13 = scmp.lt.s32.totalorder %s175_s24, %s175_s24 }
  0x36   : > { %p2464_p11 = scmp.ne.s32.totalorder %s175_s24, %s2463_s17  ;;  %p2472_p9 = scmp.lt.s32.totalorder %s2463_s17, %s2463_s17 }
  0x38   : > { %p2466_p1 = pnand %p2464_p11, %p2452_p4  ;;  %p2473_p8 = por %p2472_p9, %p2471_p13 }
  0x3a   : > { %p2467_p12 = pneg %p2466_p1 }
  0x3c   : > { %p2474_p0 = pnand %p2473_p8, %p2467_p12 }
  0x3e   : > { %2477 = shalt.err (!%p2474_p0)
}
  0x3f   : > { %s2983_s18 = smov 192   ;;  %s2984_s23 = smov 12  }
  0x40   : > { %2266 = dma.hbm_to_vmem [thread:$0]  (!%p3115_p2), %s3751_s2, 9216, %s175_s24, [#allocation8], %s2983_s18, %s2983_s18, %s2984_s23  }
  0x41   : > { %s3752_s3 = sld [smem:[#allocation52_spill]] }
  0x47   : > { %s2478_s8 = scalar_lea.hbm %s3752_s3, 6144 }
  0x48   : > { %p2479_p3 = scmp.ne.s32.totalorder %s3752_s3, %s2478_s8  ;;  %p2485_p12 = scmp.lt.u32.totalorder %s2478_s8, %s3752_s3 }
  0x4a   : > { %p2481_p8 = pnand %p2479_p3, %p2452_p4 }
  0x4c   : > { %p2482_p9 = pneg %p2481_p8 }
  0x4e   : > { %p2487_p13 = pnand %p2485_p12, %p2482_p9 }
  0x50   : > { %2490 = shalt.err (!%p2487_p13)
}
  0x51   : > { %s2491_s24 = scalar_lea.vmem %s3119_s27, 6144  ;;  %p2499_p7 = scmp.lt.s32.totalorder %s3119_s27, %s3119_s27 }
  0x52   : > { %p2492_p0 = scmp.ne.s32.totalorder %s3119_s27, %s2491_s24  ;;  %p2500_p10 = scmp.lt.s32.totalorder %s2491_s24, %s2491_s24 }
  0x54   : > { %p2494_p5 = pnand %p2492_p0, %p2452_p4  ;;  %p2501_p11 = por %p2500_p10, %p2499_p7 }
  0x56   : > { %p2495_p6 = pneg %p2494_p5 }
  0x58   : > { %p2502_p1 = pnand %p2501_p11, %p2495_p6 }
  0x5a   : > { %2505 = shalt.err (!%p2502_p1)
}
  0x5b   : > { %s2985_s18 = smov 384   ;;  %s2986_s23 = smov 24  }
  0x5c   : > { %2269 = dma.hbm_to_vmem [thread:$0]  (!%p3115_p2), %s3752_s3, 6144, %s3119_s27, [#allocation11], %s2985_s18, %s2985_s18, %s2986_s23  }
  0x5d   : > { %p3753_p3 = scmp.ne.s32.totalorder %s3749_s22, 0 }
  0x5f   : > { %212 = sbr.rel (%p3753_p3) target bundleno = 995 (0x3e3), region = 40 }
  0x66   : > { %p3754_p4 = scmp.eq.s32.totalorder %s3078_s0, 0 }
  0x68   : > { %2937 = dma.done.wait (%p3754_p4), [#allocation8], 9216   ;;  %p3755_p8 = pmov %p3754_p4 }
  0x69   : > { %p3756_p9 = pmov %p3754_p4 }
  0x6a   : > { %2939 = vsyncadd (%p3755_p8), [#allocation8], 4294958080 }
  0x6b   : > { %2941 = dma.done.wait (%p3756_p9), [#allocation11], 6144   ;;  %p3757_p12 = pmov %p3754_p4 }
  0x6c   : > { %s3715_s25 = sand.u32 1, %s2970_s12   ;;  %p3759_p2 = scmp.ne.s32.totalorder %s3078_s0, 0 }
  0x6d   : > { %2943 = vsyncadd (%p3757_p12), [#allocation11], 4294961152  ;;  %s3181_s27 = sshll.u32 %s3715_s25, 3  ;;  %s246_s29 = sld [smem:[#allocation6]] (!%p3759_p2) }
  0x6e   : > { %3758 = sst [smem:[#allocation50_spill]] %s3181_s27  ;;  %243 = sbr.rel (%p3759_p2) target bundleno = 330 (0x14a), region = 52 }
  0x6f   : > { %s3760_s6 = sld [smem:[#allocation54_spill]] (!%p3759_p2)  ;;  %s2987_s9 = smov (!%p3759_p2), [#allocation2]  }
  0x70   : > { %s258_s10 = sshll.u32 (!%p3759_p2), %s2987_s9, 4  ;;  %s1842_s15 = sld [smem:[#allocation6 + $0x1]] (!%p3759_p2)  ;;  %s3189_s10 = int_to_ptr.vmem [resolvable:$true] %s258_s10 }
  0x71   : > { %s2988_s17 = smov (!%p3759_p2), [#allocation2 + $0x1]   ;;  %s3191_s18 = sld [smem:[#allocation6 + $0x2]] (!%p3759_p2) }
  0x72   : > { %s276_s24 = sshll.u32 (!%p3759_p2), %s2988_s17, 4  ;;  %s2989_s23 = smov (!%p3759_p2), [#allocation2 + $0x2]   ;;  %s3193_s24 = int_to_ptr.vmem [resolvable:$true] %s276_s24 }
  0x73   : > { %p247_p13 = scmp.gt.s32.totalorder (!%p3759_p2), %s246_s29, 0  ;;  %p1836_p0 = scmp.lt.s32.totalorder (!%p3759_p2), %s246_s29, 511 }
  0x74   : > { %s3195_s26 = sshll.u32 (!%p3759_p2), %s2989_s23, 4  ;;  %s3197_s28 = sld [smem:[#allocation6 + $0x3]] (!%p3759_p2)  ;;  %s3230_s26 = int_to_ptr.vmem [resolvable:$true] %s3195_s26 }
  0x75   : > { %v244_v0 = vld [vmem:[%s3760_s6] sm:$0xff]  ;;  %s3786_s29 = smov (!%p247_p13, %s246_s29), 0 }
  0x76   : > { %245 = vst [vmem:[#allocation4] sm:$0xff] %v244_v0  ;;  %p263_p5 = scmp.gt.s32.totalorder %s1842_s15, 0  ;;  %p1843_p6 = scmp.lt.s32.totalorder %s1842_s15, 511 }
  0x77   : > { %s3788_s29 = smov (!%p1836_p0, %s3786_s29), 511  ;;  %p281_p7 = scmp.gt.s32.totalorder %s3191_s18, 0 }
  0x78   : > { %s3790_s15 = smov (!%p263_p5, %s1842_s15), 0  ;;  %s251_s30 = sshrl.u32 %s3788_s29, 3 }
  0x79   : > { %s252_s8 = sand.u32 7, %s3788_s29   ;;  %s253_s9 = smul.u32 24, %s251_s30 }
  0x7a   : > { %s3792_s15 = smov (!%p1843_p6, %s3790_s15), 511  ;;  %p1850_p10 = scmp.lt.s32.totalorder %s3191_s18, 511 }
  0x7b   : > { %s254_s17 = sadd.s32 %s253_s9, %s252_s8  ;;  %s267_s23 = sshrl.u32 %s3792_s15, 3 }
  0x7c   : > { %s1841_s25 = sshll.u32 %s254_s17, 4  ;;  %s268_s6 = sand.u32 7, %s3792_s15  }
  0x7d   : > { %s256_s3 = scalar_lea.hbm %s3705_s1, %s1841_s25  ;;  %s3211_s29 = scalar_lea.hbm %s3705_s1, 24576 }
  0x7e   : > { %s2506_s19 = scalar_lea.hbm %s256_s3, 48  ;;  %p2509_p1 = scmp.lt.u32.totalorder %s256_s3, %s3705_s1 }
  0x7f   : > { %p2507_p11 = scmp.ne.s32.totalorder %s256_s3, %s2506_s19  ;;  %p2510_p3 = scmp.lt.u32.totalorder %s3211_s29, %s2506_s19 }
  0x80   : > { %p2512_p8 = scmp.lt.u32.totalorder %s2506_s19, %s256_s3 }
  0x81   : > { %p2511_p4 = por %p2510_p3, %p2509_p1 }
  0x83   : > { %p2513_p9 = por %p2512_p8, %p2511_p4 }
  0x85   : > { %p2514_p12 = pnand %p2513_p9, %p2507_p11 }
  0x87   : > { %2517 = shalt.err (!%p2514_p12)  }
  0x88   : > { %s2518_s2 = scalar_lea.vmem %s3189_s10, 48  ;;  %s3220_s13 = scalar_lea.vmem %s3189_s10, 768 }
  0x89   : > { %p2519_p2 = scmp.ne.s32.totalorder %s3189_s10, %s2518_s2  ;;  %p2523_p13 = scmp.lt.s32.totalorder %s3189_s10, %s3189_s10 }
  0x8a   : > { %p2524_p0 = scmp.lt.s32.totalorder %s3220_s13, %s2518_s2 }
  0x8c   : > { %p2525_p5 = por %p2524_p0, %p2523_p13 }
  0x8e   : > { %p2526_p6 = pnand %p2525_p5, %p2519_p2 }
  0x90   : > { %2529 = shalt.err (!%p2526_p6)  }
  0x91   : > { %s3721_s16 = smov 128   ;;  %s3723_s19 = smov 1  }
  0x92   : > { %261 = dma.hbm_to_vmem [thread:$0]  %s256_s3, 48, %s3189_s10, [#allocation3], %s3721_s16, %s3721_s16, %s3723_s19 }
  0x93   : > { %s269_s21 = smul.u32 24, %s267_s23  ;;  %p299_p11 = scmp.gt.s32.totalorder %s3197_s28, 0 }
  0x94   : > { %s282_s25 = scalar_select %p281_p7, %s3191_s18, 0 }
  0x95   : > { %s270_s22 = sadd.s32 %s269_s21, %s268_s6 }
  0x96   : > { %s1848_s15 = sshll.u32 %s270_s22, 4 }
  0x97   : > { %s272_s17 = scalar_lea.hbm %s3705_s1, %s1848_s15 }
  0x98   : > { %s2530_s30 = scalar_lea.hbm %s272_s17, 48  ;;  %p2533_p4 = scmp.lt.u32.totalorder %s272_s17, %s3705_s1 }
  0x99   : > { %p2531_p3 = scmp.ne.s32.totalorder %s272_s17, %s2530_s30  ;;  %p2534_p8 = scmp.lt.u32.totalorder %s3211_s29, %s2530_s30 }
  0x9a   : > { %p2536_p12 = scmp.lt.u32.totalorder %s2530_s30, %s272_s17 }
  0x9b   : > { %p2535_p9 = por %p2534_p8, %p2533_p4 }
  0x9d   : > { %p2537_p2 = por %p2536_p12, %p2535_p9 }
  0x9f   : > { %p2538_p13 = pnand %p2537_p2, %p2531_p3 }
  0xa1   : > { %2541 = shalt.err (!%p2538_p13)  }
  0xa2   : > { %s2542_s3 = scalar_lea.vmem %s3193_s24, 48  ;;  %p2547_p0 = scmp.lt.s32.totalorder %s3193_s24, %s3189_s10 }
  0xa3   : > { %p2543_p7 = scmp.ne.s32.totalorder %s3193_s24, %s2542_s3  ;;  %p2548_p5 = scmp.lt.s32.totalorder %s3220_s13, %s2542_s3 }
  0xa5   : > { %p2549_p6 = por %p2548_p5, %p2547_p0 }
  0xa7   : > { %p2550_p1 = pnand %p2549_p6, %p2543_p7 }
  0xa9   : > { %2553 = shalt.err (!%p2550_p1)  }
  0xaa   : > { %279 = dma.hbm_to_vmem [thread:$0]  %s272_s17, 48, %s3193_s24, [#allocation3 + $0x1], %s3721_s16, %s3721_s16, %s3723_s19 }
  0xab   : > { %s3794_s25 = smov (!%p1850_p10, %s282_s25), 511  ;;  %s2992_s22 = smov [#allocation2 + $0x3]  }
  0xac   : > { %s300_s6 = scalar_select %p299_p11, %s3197_s28, 0 }
  0xad   : > { %s285_s11 = sshrl.u32 %s3794_s25, 3  ;;  %s286_s23 = sand.u32 7, %s3794_s25  }
  0xae   : > { %s287_s21 = smul.u32 24, %s285_s11  ;;  %s312_s15 = sshll.u32 %s2992_s22, 4  ;;  %s3260_s15 = int_to_ptr.vmem [resolvable:$true] %s312_s15 }
  0xaf   : > { %p3761_p1 = scmp.lt.s32.totalorder %s3197_s28, 511 }
  0xb0   : > { %s288_s8 = sadd.s32 %s287_s21, %s286_s23 }
  0xb1   : > { %s3796_s6 = smov (!%p3761_p1, %s300_s6), 511  ;;  %s1855_s9 = sshll.u32 %s288_s8, 4 }
  0xb2   : > { %s303_s30 = sshrl.u32 %s3796_s6, 3  ;;  %s290_s24 = scalar_lea.hbm %s3705_s1, %s1855_s9 }
  0xb3   : > { %s304_s18 = sand.u32 7, %s3796_s6   ;;  %s2554_s17 = scalar_lea.hbm %s290_s24, 48 }
  0xb4   : > { %p2555_p10 = scmp.ne.s32.totalorder %s290_s24, %s2554_s17  ;;  %p2557_p11 = scmp.lt.u32.totalorder %s290_s24, %s3705_s1 }
  0xb5   : > { %p2558_p3 = scmp.lt.u32.totalorder %s3211_s29, %s2554_s17  ;;  %p2560_p8 = scmp.lt.u32.totalorder %s2554_s17, %s290_s24 }
  0xb7   : > { %p2559_p4 = por %p2558_p3, %p2557_p11 }
  0xb9   : > { %p2561_p9 = por %p2560_p8, %p2559_p4 }
  0xbb   : > { %p2562_p12 = pnand %p2561_p9, %p2555_p10 }
  0xbd   : > { %2565 = shalt.err (!%p2562_p12)  }
  0xbe   : > { %s2566_s28 = scalar_lea.vmem %s3230_s26, 48  ;;  %p2571_p13 = scmp.lt.s32.totalorder %s3230_s26, %s3189_s10 }
  0xbf   : > { %p2567_p2 = scmp.ne.s32.totalorder %s3230_s26, %s2566_s28  ;;  %p2572_p7 = scmp.lt.s32.totalorder %s3220_s13, %s2566_s28 }
  0xc1   : > { %p2573_p0 = por %p2572_p7, %p2571_p13 }
  0xc3   : > { %p2574_p5 = pnand %p2573_p0, %p2567_p2 }
  0xc5   : > { %2577 = shalt.err (!%p2574_p5)  }
  0xc6   : > { %s3762_s16 = smov 1   ;;  %s3763_s19 = smov 128  }
  0xc7   : > { %297 = dma.hbm_to_vmem [thread:$0]  %s290_s24, 48, %s3230_s26, [#allocation3 + $0x2], %s3763_s19, %s3763_s19, %s3762_s16 }
  0xc8   : > { %s305_s25 = smul.u32 24, %s303_s30  ;;  %s3278_s6 = sld [smem:[#allocation6 + $0x4]] }
  0xc9   : > { %s3280_s11 = sld [smem:[#allocation6 + $0x5]]  ;;  %s2993_s21 = smov [#allocation2 + $0x4]  }
  0xca   : > { %s306_s23 = sadd.s32 %s305_s25, %s304_s18  ;;  %s330_s22 = sshll.u32 %s2993_s21, 4  ;;  %s3282_s22 = int_to_ptr.vmem [resolvable:$true] %s330_s22 }
  0xcb   : > { %s1862_s8 = sshll.u32 %s306_s23, 4 }
  0xcc   : > { %s308_s3 = scalar_lea.hbm %s3705_s1, %s1862_s8 }
  0xcd   : > { %s2578_s17 = scalar_lea.hbm %s308_s3, 48  ;;  %p2581_p1 = scmp.lt.u32.totalorder %s308_s3, %s3705_s1 }
  0xce   : > { %p2579_p6 = scmp.ne.s32.totalorder %s308_s3, %s2578_s17  ;;  %p2582_p10 = scmp.lt.u32.totalorder %s3211_s29, %s2578_s17 }
  0xcf   : > { %p2584_p3 = scmp.lt.u32.totalorder %s2578_s17, %s308_s3 }
  0xd0   : > { %p2583_p11 = por %p2582_p10, %p2581_p1 }
  0xd2   : > { %p2585_p4 = por %p2584_p3, %p2583_p11 }
  0xd4   : > { %p2586_p8 = pnand %p2585_p4, %p2579_p6 }
  0xd6   : > { %2589 = shalt.err (!%p2586_p8)  }
  0xd7   : > { %s2590_s26 = scalar_lea.vmem %s3260_s15, 48  ;;  %p2595_p12 = scmp.lt.s32.totalorder %s3260_s15, %s3189_s10 }
  0xd8   : > { %p2591_p9 = scmp.ne.s32.totalorder %s3260_s15, %s2590_s26  ;;  %p2596_p2 = scmp.lt.s32.totalorder %s3220_s13, %s2590_s26 }
  0xda   : > { %p2597_p13 = por %p2596_p2, %p2595_p12 }
  0xdc   : > { %p2598_p7 = pnand %p2597_p13, %p2591_p9 }
  0xde   : > { %2601 = shalt.err (!%p2598_p7)  }
  0xdf   : > { %315 = dma.hbm_to_vmem [thread:$0]  %s308_s3, 48, %s3260_s15, [#allocation3 + $0x3], %s3763_s19, %s3763_s19, %s3762_s16 }
  0xe0   : > { %p317_p0 = scmp.gt.s32.totalorder %s3278_s6, 0  ;;  %p1864_p5 = scmp.lt.s32.totalorder %s3278_s6, 511 }
  0xe1   : > { %p335_p6 = scmp.gt.s32.totalorder %s3280_s11, 0  ;;  %p1871_p1 = scmp.lt.s32.totalorder %s3280_s11, 511 }
  0xe2   : > { %s3798_s6 = smov (!%p317_p0, %s3278_s6), 0  ;;  %s2994_s8 = smov [#allocation2 + $0x5]  }
  0xe3   : > { %s3800_s11 = smov (!%p335_p6, %s3280_s11), 0  ;;  %s3802_s6 = smov (!%p1864_p5, %s3798_s6), 511 }
  0xe4   : > { %s3804_s11 = smov (!%p1871_p1, %s3800_s11), 511  ;;  %s321_s14 = sshrl.u32 %s3802_s6, 3 }
  0xe5   : > { %s322_s30 = sand.u32 7, %s3802_s6   ;;  %s323_s24 = smul.u32 24, %s321_s14 }
  0xe6   : > { %s339_s18 = sshrl.u32 %s3804_s11, 3  ;;  %s340_s25 = sand.u32 7, %s3804_s11  }
  0xe7   : > { %s341_s23 = smul.u32 24, %s339_s18  ;;  %s324_s21 = sadd.s32 %s323_s24, %s322_s30 }
  0xe8   : > { %s348_s9 = sshll.u32 %s2994_s8, 4  ;;  %s1869_s2 = sshll.u32 %s324_s21, 4  ;;  %s349_s9 = int_to_ptr.vmem [resolvable:$true] %s348_s9 }
  0xe9   : > { %s342_s15 = sadd.s32 %s341_s23, %s340_s25  ;;  %s326_s28 = scalar_lea.hbm %s3705_s1, %s1869_s2 }
  0xea   : > { %s1876_s26 = sshll.u32 %s342_s15, 4  ;;  %s2602_s7 = scalar_lea.hbm %s326_s28, 48 }
  0xeb   : > { %p2603_p10 = scmp.ne.s32.totalorder %s326_s28, %s2602_s7  ;;  %p2605_p11 = scmp.lt.u32.totalorder %s326_s28, %s3705_s1 }
  0xec   : > { %p2606_p3 = scmp.lt.u32.totalorder %s3211_s29, %s2602_s7  ;;  %p2608_p8 = scmp.lt.u32.totalorder %s2602_s7, %s326_s28 }
  0xee   : > { %p2607_p4 = por %p2606_p3, %p2605_p11 }
  0xf0   : > { %p2609_p9 = por %p2608_p8, %p2607_p4 }
  0xf2   : > { %p2610_p12 = pnand %p2609_p9, %p2603_p10 }
  0xf4   : > { %2613 = shalt.err (!%p2610_p12)  }
  0xf5   : > { %s2614_s6 = scalar_lea.vmem %s3282_s22, 48  ;;  %p2619_p13 = scmp.lt.s32.totalorder %s3282_s22, %s3189_s10 }
  0xf6   : > { %p2615_p2 = scmp.ne.s32.totalorder %s3282_s22, %s2614_s6  ;;  %p2620_p7 = scmp.lt.s32.totalorder %s3220_s13, %s2614_s6 }
  0xf8   : > { %p2621_p0 = por %p2620_p7, %p2619_p13 }
  0xfa   : > { %p2622_p5 = pnand %p2621_p0, %p2615_p2 }
  0xfc   : > { %2625 = shalt.err (!%p2622_p5)  }
  0xfd   : > { %333 = dma.hbm_to_vmem [thread:$0]  %s326_s28, 48, %s3282_s22, [#allocation3 + $0x4], %s3763_s19, %s3763_s19, %s3762_s16 }
  0xfe   : > { %s344_s20 = scalar_lea.hbm %s3705_s1, %s1876_s26 }
  0xff   : > { %s2626_s11 = scalar_lea.hbm %s344_s20, 48  ;;  %p2629_p1 = scmp.lt.u32.totalorder %s344_s20, %s3705_s1 }
 0x100   : > { %p2627_p6 = scmp.ne.s32.totalorder %s344_s20, %s2626_s11  ;;  %p2630_p10 = scmp.lt.u32.totalorder %s3211_s29, %s2626_s11 }
 0x101   : > { %p2632_p3 = scmp.lt.u32.totalorder %s2626_s11, %s344_s20 }
 0x102   : > { %p2631_p11 = por %p2630_p10, %p2629_p1 }
 0x104   : > { %p2633_p4 = por %p2632_p3, %p2631_p11 }
 0x106   : > { %p2634_p8 = pnand %p2633_p4, %p2627_p6 }
 0x108   : > { %2637 = shalt.err (!%p2634_p8)  }
 0x109   : > { %s2638_s24 = scalar_lea.vmem %s349_s9, 48  ;;  %p2643_p12 = scmp.lt.s32.totalorder %s349_s9, %s3189_s10 }
 0x10a   : > { %p2639_p9 = scmp.ne.s32.totalorder %s349_s9, %s2638_s24  ;;  %p2644_p2 = scmp.lt.s32.totalorder %s3220_s13, %s2638_s24 }
 0x10c   : > { %p2645_p13 = por %p2644_p2, %p2643_p12 }
 0x10e   : > { %p2646_p7 = pnand %p2645_p13, %p2639_p9 }
 0x110   : > { %2649 = shalt.err (!%p2646_p7)  }
 0x111   : > { %351 = dma.hbm_to_vmem [thread:$0]  %s344_s20, 48, %s349_s9, [#allocation3 + $0x5], %s3763_s19, %s3763_s19, %s3762_s16 }
 0x112   : > { %s1877_s22 = sld [smem:[#allocation6 + $0x6]]  ;;  %s1884_s18 = sld [smem:[#allocation6 + $0x7]] }
 0x113   : > { %s2995_s25 = smov [#allocation2 + $0x6]   ;;  %s2996_s21 = smov [#allocation2 + $0x7]  }
 0x114   : > { %s366_s23 = sshll.u32 %s2995_s25, 4  ;;  %s384_s8 = sshll.u32 %s2996_s21, 4  ;;  %s3334_s23 = int_to_ptr.vmem [resolvable:$true] %s366_s23  ;;  %s3336_s8 = int_to_ptr.vmem [resolvable:$true] %s384_s8 }
 0x118   : > { %p353_p0 = scmp.gt.s32.totalorder %s1877_s22, 0  ;;  %p1878_p5 = scmp.lt.s32.totalorder %s1877_s22, 511 }
 0x119   : > { %p371_p6 = scmp.gt.s32.totalorder %s1884_s18, 0  ;;  %p1885_p1 = scmp.lt.s32.totalorder %s1884_s18, 511 }
 0x11a   : > { %s3806_s22 = smov (!%p353_p0, %s1877_s22), 0 }
 0x11b   : > { %s3808_s18 = smov (!%p371_p6, %s1884_s18), 0  ;;  %s3810_s22 = smov (!%p1878_p5, %s3806_s22), 511 }
 0x11c   : > { %s3812_s18 = smov (!%p1885_p1, %s3808_s18), 511  ;;  %s357_s2 = sshrl.u32 %s3810_s22, 3 }
 0x11d   : > { %s358_s15 = sand.u32 7, %s3810_s22   ;;  %s359_s9 = smul.u32 24, %s357_s2 }
 0x11e   : > { %s375_s3 = sshrl.u32 %s3812_s18, 3  ;;  %s376_s17 = sand.u32 7, %s3812_s18  }
 0x11f   : > { %s377_s28 = smul.u32 24, %s375_s3  ;;  %s360_s26 = sadd.s32 %s359_s9, %s358_s15 }
 0x120   : > { %s1883_s6 = sshll.u32 %s360_s26, 4 }
 0x121   : > { %s378_s7 = sadd.s32 %s377_s28, %s376_s17  ;;  %s362_s11 = scalar_lea.hbm %s3705_s1, %s1883_s6 }
 0x122   : > { %s1890_s14 = sshll.u32 %s378_s7, 4  ;;  %s2650_s30 = scalar_lea.hbm %s362_s11, 48 }
 0x123   : > { %p2651_p10 = scmp.ne.s32.totalorder %s362_s11, %s2650_s30  ;;  %p2653_p11 = scmp.lt.u32.totalorder %s362_s11, %s3705_s1 }
 0x124   : > { %p2654_p3 = scmp.lt.u32.totalorder %s3211_s29, %s2650_s30  ;;  %p2656_p8 = scmp.lt.u32.totalorder %s2650_s30, %s362_s11 }
 0x126   : > { %p2655_p4 = por %p2654_p3, %p2653_p11 }
 0x128   : > { %p2657_p9 = por %p2656_p8, %p2655_p4 }
 0x12a   : > { %p2658_p12 = pnand %p2657_p9, %p2651_p10 }
 0x12c   : > { %2661 = shalt.err (!%p2658_p12)  }
 0x12d   : > { %s2662_s22 = scalar_lea.vmem %s3334_s23, 48  ;;  %p2667_p13 = scmp.lt.s32.totalorder %s3334_s23, %s3189_s10 }
 0x12e   : > { %p2663_p2 = scmp.ne.s32.totalorder %s3334_s23, %s2662_s22  ;;  %p2668_p7 = scmp.lt.s32.totalorder %s3220_s13, %s2662_s22 }
 0x130   : > { %p2669_p0 = por %p2668_p7, %p2667_p13 }
 0x132   : > { %p2670_p5 = pnand %p2669_p0, %p2663_p2 }
 0x134   : > { %2673 = shalt.err (!%p2670_p5)  }
 0x135   : > { %369 = dma.hbm_to_vmem [thread:$0]  %s362_s11, 48, %s3334_s23, [#allocation3 + $0x6], %s3763_s19, %s3763_s19, %s3762_s16 }
 0x136   : > { %s380_s2 = scalar_lea.hbm %s3705_s1, %s1890_s14 }
 0x137   : > { %s2674_s15 = scalar_lea.hbm %s380_s2, 48  ;;  %p2677_p1 = scmp.lt.u32.totalorder %s380_s2, %s3705_s1 }
 0x138   : > { %p2675_p6 = scmp.ne.s32.totalorder %s380_s2, %s2674_s15  ;;  %p2678_p10 = scmp.lt.u32.totalorder %s3211_s29, %s2674_s15 }
 0x139   : > { %p2680_p3 = scmp.lt.u32.totalorder %s2674_s15, %s380_s2 }
 0x13a   : > { %p2679_p11 = por %p2678_p10, %p2677_p1 }
 0x13c   : > { %p2681_p4 = por %p2680_p3, %p2679_p11 }
 0x13e   : > { %p2682_p8 = pnand %p2681_p4, %p2675_p6 }
 0x140   : > { %2685 = shalt.err (!%p2682_p8)  }
 0x141   : > { %s2686_s23 = scalar_lea.vmem %s3336_s8, 48  ;;  %p2691_p12 = scmp.lt.s32.totalorder %s3336_s8, %s3189_s10 }
 0x142   : > { %p2687_p9 = scmp.ne.s32.totalorder %s3336_s8, %s2686_s23  ;;  %p2692_p2 = scmp.lt.s32.totalorder %s3220_s13, %s2686_s23 }
 0x144   : > { %p2693_p13 = por %p2692_p2, %p2691_p12 }
 0x146   : > { %p2694_p7 = pnand %p2693_p13, %p2687_p9 }
 0x148   : > { %2697 = shalt.err (!%p2694_p7)  }
 0x149   : > { %387 = dma.hbm_to_vmem [thread:$0]  %s380_s2, 48, %s3336_s8, [#allocation3 + $0x7], %s3763_s19, %s3763_s19, %s3762_s16 }
 0x14a PF: > { %p388_p0 = scmp.lt.s32.totalorder %s3078_s0, 0  ;;  %s389_s29 = ssub.s32 0, %s3078_s0 }
 0x14b   : > { %s1891_s17 = smin.u32 %s3078_s0, %s389_s29 }
 0x14c   : > { %s391_s28 = sand.u32 1, %s1891_s17  }
 0x14d   : > { %s392_s26 = ssub.s32 0, %s391_s28 }
 0x14e   : > { %s3814_s26 = smov (!%p388_p0, %s392_s26), %s391_s28 }
 0x14f   : > { %s1892_s10 = sshll.u32 %s3814_s26, 3 }
 0x150   : > { %s395_s13 = scalar_lea.sflag [#allocation3], %s1892_s10 }
 0x151   : > { %2944 = dma.done.wait %s395_s13, 48 }
 0x152   : > { %2945 = vsyncadd %s395_s13, 4294967248  ;;  %s1687_s6 = scalar_lea.sflag %s395_s13, 1 [#allocation3] }
 0x153   : > { %2946 = dma.done.wait %s1687_s6, 48 }
 0x154   : > { %2947 = vsyncadd %s1687_s6, 4294967248  ;;  %s1690_s16 = scalar_lea.sflag %s395_s13, 2 [#allocation3] }
 0x155   : > { %2948 = dma.done.wait %s1690_s16, 48 }
 0x156   : > { %2949 = vsyncadd %s1690_s16, 4294967248  ;;  %s1693_s19 = scalar_lea.sflag %s395_s13, 3 [#allocation3] }
 0x157   : > { %2950 = dma.done.wait %s1693_s19, 48 }
 0x158   : > { %2951 = vsyncadd %s1693_s19, 4294967248  ;;  %s1696_s8 = scalar_lea.sflag %s395_s13, 4 [#allocation3] }
 0x159   : > { %2952 = dma.done.wait %s1696_s8, 48 }
 0x15a   : > { %2953 = vsyncadd %s1696_s8, 4294967248  ;;  %s1699_s7 = scalar_lea.sflag %s395_s13, 5 [#allocation3] }
 0x15b   : > { %2954 = dma.done.wait %s1699_s7, 48 }
 0x15c   : > { %2955 = vsyncadd %s1699_s7, 4294967248  ;;  %s1702_s12 = scalar_lea.sflag %s395_s13, 6 [#allocation3] }
 0x15d   : > { %2956 = dma.done.wait %s1702_s12, 48 }
 0x15e   : > { %2957 = vsyncadd %s1702_s12, 4294967248  ;;  %s1705_s20 = scalar_lea.sflag %s395_s13, 7 [#allocation3] }
 0x15f   : > { %2958 = dma.done.wait %s1705_s20, 48 }
 0x160   : > { %2959 = vsyncadd %s1705_s20, 4294967248  ;;  %s427_s11 = sadd.s32 1, %s3078_s0 }
 0x161   : > { %p1900_p5 = scmp.ge.s32.totalorder %s427_s11, 6 }
 0x162   : > { %s432_s14 = ssub.s32 (!%p1900_p5), 1, %s3814_s26  ;;  %s2069_s30 = sshll.u32 (!%p1900_p5), %s3078_s0, 7 }
 0x163   : > { %431 = sbr.rel (%p1900_p5) target bundleno = 587 (0x24b), region = 56  ;;  %s3379_s24 = sadd.s32 (!%p1900_p5), 128, %s2069_s30 }
 0x164   : > { %s445_s25 = smul.u32 (!%p1900_p5), 24, %s432_s14  ;;  %s434_s22 = sld [smem:[#allocation6 + %s3379_s24]] (!%p1900_p5) }
 0x165   : > { %s1908_s18 = sshll.u32 (!%p1900_p5), %s432_s14, 3  ;;  %s454_s15 = sadd.s32 (!%p1900_p5), 1, %s3379_s24 }
 0x166   : > { %s3382_s21 = scalar_lea.vmem (!%p1900_p5), [#allocation2], %s445_s25  ;;  %s3388_s9 = sld [smem:[#allocation6 + %s454_s15]] (!%p1900_p5) }
 0x167   : > { %s450_s2 = sshll.u32 (!%p1900_p5), %s3382_s21, 4  ;;  %s1720_s3 = scalar_lea.vmem (!%p1900_p5), %s3382_s21, 1 [#allocation2]  ;;  %s3385_s2 = int_to_ptr.vmem [resolvable:$true] %s450_s2 }
 0x168   : > { %s475_s23 = sadd.s32 (!%p1900_p5), 2, %s3379_s24  ;;  %s3392_s29 = scalar_lea.sflag (!%p1900_p5), [#allocation3], %s1908_s18 }
 0x169   : > { %s3395_s28 = sld [smem:[#allocation6 + %s475_s23]] (!%p1900_p5)  ;;  %s3398_s10 = sshll.u32 (!%p1900_p5), %s1720_s3, 4  ;;  %s472_s10 = int_to_ptr.vmem [resolvable:$true] %s3398_s10 }
 0x16a   : > { %p435_p6 = scmp.gt.s32.totalorder %s434_s22, 0  ;;  %p1902_p1 = scmp.lt.s32.totalorder %s434_s22, 511 }
 0x16b   : > { %s1730_s7 = scalar_lea.vmem %s3382_s21, 2 [#allocation2]  ;;  %s3417_s18 = scalar_lea.hbm %s3705_s1, 24576 }
 0x16c   : > { %s3816_s22 = smov (!%p435_p6, %s434_s22), 0  ;;  %p456_p10 = scmp.gt.s32.totalorder %s3388_s9, 0 }
 0x16d   : > { %s3818_s22 = smov (!%p1902_p1, %s3816_s22), 511  ;;  %p1909_p11 = scmp.lt.s32.totalorder %s3388_s9, 511 }
 0x16e   : > { %s439_s13 = sshrl.u32 %s3818_s22, 3  ;;  %s440_s6 = sand.u32 7, %s3818_s22  }
 0x16f   : > { %s441_s16 = smul.u32 24, %s439_s13  ;;  %p477_p3 = scmp.gt.s32.totalorder %s3395_s28, 0 }
 0x170   : > { %s3402_s19 = scalar_select %p456_p10, %s3388_s9, 0 }
 0x171   : > { %s442_s8 = sadd.s32 %s441_s16, %s440_s6  ;;  %p1916_p4 = scmp.lt.s32.totalorder %s3395_s28, 511 }
 0x172   : > { %s1907_s12 = sshll.u32 %s442_s8, 4 }
 0x173   : > { %s3409_s14 = scalar_lea.hbm %s3705_s1, %s1907_s12 }
 0x174   : > { %s2698_s30 = scalar_lea.hbm %s3409_s14, 48  ;;  %p2701_p9 = scmp.lt.u32.totalorder %s3409_s14, %s3705_s1 }
 0x175   : > { %p2699_p8 = scmp.ne.s32.totalorder %s3409_s14, %s2698_s30  ;;  %p2702_p12 = scmp.lt.u32.totalorder %s3417_s18, %s2698_s30 }
 0x176   : > { %p2704_p13 = scmp.lt.u32.totalorder %s2698_s30, %s3409_s14 }
 0x177   : > { %p2703_p2 = por %p2702_p12, %p2701_p9 }
 0x179   : > { %p2705_p7 = por %p2704_p13, %p2703_p2 }
 0x17b   : > { %p2706_p0 = pnand %p2705_p7, %p2699_p8 }
 0x17d   : > { %2709 = shalt.err (!%p2706_p0)  }
 0x17e   : > { %s2710_s23 = scalar_lea.vmem %s3385_s2, 48  ;;  %s2997_s13 = smov [#allocation2]  }
 0x17f   : > { %p2711_p5 = scmp.ne.s32.totalorder %s3385_s2, %s2710_s23  ;;  %s2712_s6 = sshll.u32 %s2997_s13, 4  ;;  %s3427_s6 = int_to_ptr.vmem [resolvable:$false] %s2712_s6 }
 0x180   : > { %s3430_s16 = scalar_lea.vmem %s3427_s6, 768  ;;  %p2715_p6 = scmp.lt.s32.totalorder %s3385_s2, %s3427_s6 }
 0x181   : > { %p2716_p1 = scmp.lt.s32.totalorder %s3430_s16, %s2710_s23 }
 0x183   : > { %p2717_p10 = por %p2716_p1, %p2715_p6 }
 0x185   : > { %p2718_p9 = pnand %p2717_p10, %p2711_p5 }
 0x187   : > { %2721 = shalt.err (!%p2718_p9)  }
 0x188   : > { %s2998_s8 = smov 128   ;;  %s2999_s12 = smov 1  }
 0x189   : > { %453 = dma.hbm_to_vmem [thread:$0]  %s3409_s14, 48, %s3385_s2, %s3392_s29, %s2998_s8, %s2998_s8, %s2999_s12 }
 0x18a   : > { %s3820_s19 = smov (!%p1909_p11, %s3402_s19), 511  ;;  %s492_s15 = sshll.u32 %s1730_s7, 4  ;;  %s493_s15 = int_to_ptr.vmem [resolvable:$true] %s492_s15 }
 0x18b   : > { %s478_s20 = scalar_select %p477_p3, %s3395_s28, 0 }
 0x18c   : > { %s460_s11 = sshrl.u32 %s3820_s19, 3  ;;  %s461_s30 = sand.u32 7, %s3820_s19  }
 0x18d   : > { %s462_s25 = smul.u32 24, %s460_s11  ;;  %s3822_s20 = smov (!%p1916_p4, %s478_s20), 511 }
 0x18e   : > { %s481_s23 = sshrl.u32 %s3822_s20, 3  ;;  %s482_s13 = sand.u32 7, %s3822_s20  }
 0x18f   : > { %s463_s22 = sadd.s32 %s462_s25, %s461_s30 }
 0x190   : > { %s1914_s3 = sshll.u32 %s463_s22, 4 }
 0x191   : > { %s465_s14 = scalar_lea.hbm %s3705_s1, %s1914_s3 }
 0x192   : > { %s2722_s17 = scalar_lea.hbm %s465_s14, 48  ;;  %p2725_p3 = scmp.lt.u32.totalorder %s465_s14, %s3705_s1 }
 0x193   : > { %p2723_p11 = scmp.ne.s32.totalorder %s465_s14, %s2722_s17  ;;  %p2726_p4 = scmp.lt.u32.totalorder %s3417_s18, %s2722_s17 }
 0x194   : > { %p2728_p12 = scmp.lt.u32.totalorder %s2722_s17, %s465_s14 }
 0x195   : > { %p2727_p8 = por %p2726_p4, %p2725_p3 }
 0x197   : > { %p2729_p2 = por %p2728_p12, %p2727_p8 }
 0x199   : > { %p2730_p13 = pnand %p2729_p2, %p2723_p11 }
 0x19b   : > { %2733 = shalt.err (!%p2730_p13)  }
 0x19c   : > { %s2734_s28 = scalar_lea.vmem %s472_s10, 48  ;;  %p2739_p0 = scmp.lt.s32.totalorder %s472_s10, %s3427_s6 }
 0x19d   : > { %p2735_p7 = scmp.ne.s32.totalorder %s472_s10, %s2734_s28  ;;  %p2740_p5 = scmp.lt.s32.totalorder %s3430_s16, %s2734_s28 }
 0x19f   : > { %p2741_p6 = por %p2740_p5, %p2739_p0 }
 0x1a1   : > { %p2742_p1 = pnand %p2741_p6, %p2735_p7 }
 0x1a3   : > { %2745 = shalt.err (!%p2742_p1)  }
 0x1a4   : > { %s3764_s7 = scalar_lea.sflag %s3392_s29, 1 [#allocation3]  ;;  %s483_s17 = smul.u32 24, %s481_s23 }
 0x1a5   : > { %474 = dma.hbm_to_vmem [thread:$0]  %s465_s14, 48, %s472_s10, %s3764_s7, %s2998_s8, %s2998_s8, %s2999_s12 }
 0x1a6   : > { %s496_s20 = sadd.s32 3, %s3379_s24  ;;  %s1733_s30 = scalar_lea.sflag %s3392_s29, 2 [#allocation3] }
 0x1a7   : > { %s3472_s25 = sld [smem:[#allocation6 + %s496_s20]]  ;;  %s484_s22 = sadd.s32 %s483_s17, %s482_s13 }
 0x1a8   : > { %s1921_s3 = sshll.u32 %s484_s22, 4  ;;  %s1740_s2 = scalar_lea.vmem %s3382_s21, 3 [#allocation2] }
 0x1a9   : > { %s486_s11 = scalar_lea.hbm %s3705_s1, %s1921_s3  ;;  %s1743_s28 = scalar_lea.sflag %s3392_s29, 3 [#allocation3] }
 0x1aa   : > { %s2746_s27 = scalar_lea.hbm %s486_s11, 48  ;;  %p2749_p9 = scmp.lt.u32.totalorder %s486_s11, %s3705_s1 }
 0x1ab   : > { %p2747_p10 = scmp.ne.s32.totalorder %s486_s11, %s2746_s27  ;;  %p2750_p11 = scmp.lt.u32.totalorder %s3417_s18, %s2746_s27 }
 0x1ac   : > { %p2752_p4 = scmp.lt.u32.totalorder %s2746_s27, %s486_s11 }
 0x1ad   : > { %p2751_p3 = por %p2750_p11, %p2749_p9 }
 0x1af   : > { %p2753_p8 = por %p2752_p4, %p2751_p3 }
 0x1b1   : > { %p2754_p12 = pnand %p2753_p8, %p2747_p10 }
 0x1b3   : > { %2757 = shalt.err (!%p2754_p12)  }
 0x1b4   : > { %s2758_s10 = scalar_lea.vmem %s493_s15, 48  ;;  %p2763_p13 = scmp.lt.s32.totalorder %s493_s15, %s3427_s6 }
 0x1b5   : > { %p2759_p2 = scmp.ne.s32.totalorder %s493_s15, %s2758_s10  ;;  %p2764_p7 = scmp.lt.s32.totalorder %s3430_s16, %s2758_s10 }
 0x1b7   : > { %p2765_p0 = por %p2764_p7, %p2763_p13 }
 0x1b9   : > { %p2766_p5 = pnand %p2765_p0, %p2759_p2 }
 0x1bb   : > { %2769 = shalt.err (!%p2766_p5)  }
 0x1bc   : > { %495 = dma.hbm_to_vmem [thread:$0]  %s486_s11, 48, %s493_s15, %s1733_s30, %s2998_s8, %s2998_s8, %s2999_s12 }
 0x1bd   : > { %s513_s5 = sshll.u32 %s1740_s2, 4  ;;  %s517_s0 = sadd.s32 4, %s3379_s24  ;;  %s3495_s5 = int_to_ptr.vmem [resolvable:$true] %s513_s5 }
 0x1be   : > { %p498_p6 = scmp.gt.s32.totalorder %s3472_s25, 0  ;;  %p1923_p1 = scmp.lt.s32.totalorder %s3472_s25, 511 }
 0x1bf   : > { %s3491_s27 = sld [smem:[#allocation6 + %s517_s0]]  ;;  %s1750_s23 = scalar_lea.vmem %s3382_s21, 4 [#allocation2] }
 0x1c0   : > { %s3824_s25 = smov (!%p498_p6, %s3472_s25), 0  ;;  %s538_s14 = sadd.s32 5, %s3379_s24 }
 0x1c1   : > { %s3826_s25 = smov (!%p1923_p1, %s3824_s25), 511  ;;  %s534_s13 = sshll.u32 %s1750_s23, 4  ;;  %s3502_s13 = int_to_ptr.vmem [resolvable:$true] %s534_s13 }
 0x1c2   : > { %s3498_s7 = sld [smem:[#allocation6 + %s538_s14]]  ;;  %s502_s15 = sshrl.u32 %s3826_s25, 3 }
 0x1c3   : > { %s503_s17 = sand.u32 7, %s3826_s25   ;;  %s504_s20 = smul.u32 24, %s502_s15 }
 0x1c4   : > { %s1753_s30 = scalar_lea.sflag %s3392_s29, 4 [#allocation3]  ;;  %s1760_s2 = scalar_lea.vmem %s3382_s21, 5 [#allocation2] }
 0x1c5   : > { %p519_p10 = scmp.gt.s32.totalorder %s3491_s27, 0  ;;  %s505_s22 = sadd.s32 %s504_s20, %s503_s17 }
 0x1c6   : > { %s1928_s3 = sshll.u32 %s505_s22, 4 }
 0x1c7   : > { %s507_s11 = scalar_lea.hbm %s3705_s1, %s1928_s3 }
 0x1c8   : > { %p540_p11 = scmp.gt.s32.totalorder %s3498_s7, 0  ;;  %s2770_s10 = scalar_lea.hbm %s507_s11, 48 }
 0x1c9   : > { %p2771_p3 = scmp.ne.s32.totalorder %s507_s11, %s2770_s10  ;;  %p2773_p4 = scmp.lt.u32.totalorder %s507_s11, %s3705_s1 }
 0x1ca   : > { %p2774_p8 = scmp.lt.u32.totalorder %s3417_s18, %s2770_s10  ;;  %p2776_p2 = scmp.lt.u32.totalorder %s2770_s10, %s507_s11 }
 0x1cc   : > { %p2775_p12 = por %p2774_p8, %p2773_p4 }
 0x1ce   : > { %p2777_p13 = por %p2776_p2, %p2775_p12 }
 0x1d0   : > { %p2778_p7 = pnand %p2777_p13, %p2771_p3 }
 0x1d2   : > { %2781 = shalt.err (!%p2778_p7)  }
 0x1d3   : > { %s2782_s25 = scalar_lea.vmem %s3495_s5, 48  ;;  %p2787_p5 = scmp.lt.s32.totalorder %s3495_s5, %s3427_s6 }
 0x1d4   : > { %p2783_p0 = scmp.ne.s32.totalorder %s3495_s5, %s2782_s25  ;;  %p2788_p6 = scmp.lt.s32.totalorder %s3430_s16, %s2782_s25 }
 0x1d6   : > { %p2789_p1 = por %p2788_p6, %p2787_p5 }
 0x1d8   : > { %p2790_p9 = pnand %p2789_p1, %p2783_p0 }
 0x1da   : > { %2793 = shalt.err (!%p2790_p9)  }
 0x1db   : > { %516 = dma.hbm_to_vmem [thread:$0]  %s507_s11, 48, %s3495_s5, %s1743_s28, %s2998_s8, %s2998_s8, %s2999_s12 }
 0x1dc   : > { %s520_s14 = scalar_select %p519_p10, %s3491_s27, 0 }
 0x1dd   : > { %s541_s15 = scalar_select %p540_p11, %s3498_s7, 0 }
 0x1de   : > { %p3765_p3 = scmp.lt.s32.totalorder %s3491_s27, 511  ;;  %p1937_p9 = scmp.lt.s32.totalorder %s3498_s7, 511 }
 0x1df   : > { %s3534_s17 = sshll.u32 %s1760_s2, 4  ;;  %s559_s9 = sadd.s32 6, %s3379_s24  ;;  %s556_s17 = int_to_ptr.vmem [resolvable:$true] %s3534_s17 }
 0x1e0   : > { %s3828_s14 = smov (!%p3765_p3, %s520_s14), 511  ;;  %s3830_s15 = smov (!%p1937_p9, %s541_s15), 511 }
 0x1e1   : > { %s523_s20 = sshrl.u32 %s3828_s14, 3  ;;  %s524_s22 = sand.u32 7, %s3828_s14  }
 0x1e2   : > { %s525_s3 = smul.u32 24, %s523_s20  ;;  %s3537_s10 = sld [smem:[#allocation6 + %s559_s9]] }
 0x1e3   : > { %s544_s28 = sshrl.u32 %s3830_s15, 3  ;;  %s545_s27 = sand.u32 7, %s3830_s15  }
 0x1e4   : > { %s526_s19 = sadd.s32 %s525_s3, %s524_s22 }
 0x1e5   : > { %s1935_s0 = sshll.u32 %s526_s19, 4 }
 0x1e6   : > { %s528_s23 = scalar_lea.hbm %s3705_s1, %s1935_s0 }
 0x1e7   : > { %s2794_s25 = scalar_lea.hbm %s528_s23, 48  ;;  %p2797_p11 = scmp.lt.u32.totalorder %s528_s23, %s3705_s1 }
 0x1e8   : > { %p2795_p10 = scmp.ne.s32.totalorder %s528_s23, %s2794_s25  ;;  %p2798_p4 = scmp.lt.u32.totalorder %s3417_s18, %s2794_s25 }
 0x1e9   : > { %p2800_p12 = scmp.lt.u32.totalorder %s2794_s25, %s528_s23 }
 0x1ea   : > { %p2799_p8 = por %p2798_p4, %p2797_p11 }
 0x1ec   : > { %p2801_p2 = por %p2800_p12, %p2799_p8 }
 0x1ee   : > { %p2802_p13 = pnand %p2801_p2, %p2795_p10 }
 0x1f0   : > { %2805 = shalt.err (!%p2802_p13)  }
 0x1f1   : > { %s2806_s14 = scalar_lea.vmem %s3502_s13, 48  ;;  %p2811_p0 = scmp.lt.s32.totalorder %s3502_s13, %s3427_s6 }
 0x1f2   : > { %p2807_p7 = scmp.ne.s32.totalorder %s3502_s13, %s2806_s14  ;;  %p2812_p5 = scmp.lt.s32.totalorder %s3430_s16, %s2806_s14 }
 0x1f4   : > { %p2813_p6 = por %p2812_p5, %p2811_p0 }
 0x1f6   : > { %p2814_p1 = pnand %p2813_p6, %p2807_p7 }
 0x1f8   : > { %2817 = shalt.err (!%p2814_p1)  }
 0x1f9   : > { %537 = dma.hbm_to_vmem [thread:$0]  %s528_s23, 48, %s3502_s13, %s1753_s30, %s2998_s8, %s2998_s8, %s2999_s12 }
 0x1fa   : > { %s546_s15 = smul.u32 24, %s544_s28  ;;  %s1763_s20 = scalar_lea.sflag %s3392_s29, 5 [#allocation3] }
 0x1fb   : > { %p561_p3 = scmp.gt.s32.totalorder %s3537_s10, 0  ;;  %s1770_s9 = scalar_lea.vmem %s3382_s21, 6 [#allocation2] }
 0x1fc   : > { %s547_s22 = sadd.s32 %s546_s15, %s545_s27  ;;  %p1944_p9 = scmp.lt.s32.totalorder %s3537_s10, 511 }
 0x1fd   : > { %s1942_s3 = sshll.u32 %s547_s22, 4 }
 0x1fe   : > { %s549_s5 = scalar_lea.hbm %s3705_s1, %s1942_s3 }
 0x1ff   : > { %s2818_s11 = scalar_lea.hbm %s549_s5, 48  ;;  %p2821_p11 = scmp.lt.u32.totalorder %s549_s5, %s3705_s1 }
 0x200   : > { %p2819_p10 = scmp.ne.s32.totalorder %s549_s5, %s2818_s11  ;;  %p2822_p4 = scmp.lt.u32.totalorder %s3417_s18, %s2818_s11 }
 0x201   : > { %p2824_p12 = scmp.lt.u32.totalorder %s2818_s11, %s549_s5 }
 0x202   : > { %p2823_p8 = por %p2822_p4, %p2821_p11 }
 0x204   : > { %p2825_p2 = por %p2824_p12, %p2823_p8 }
 0x206   : > { %p2826_p13 = pnand %p2825_p2, %p2819_p10 }
 0x208   : > { %2829 = shalt.err (!%p2826_p13)  }
 0x209   : > { %s2830_s13 = scalar_lea.vmem %s556_s17, 48  ;;  %p2835_p0 = scmp.lt.s32.totalorder %s556_s17, %s3427_s6 }
 0x20a   : > { %p2831_p7 = scmp.ne.s32.totalorder %s556_s17, %s2830_s13  ;;  %p2836_p5 = scmp.lt.s32.totalorder %s3430_s16, %s2830_s13 }
 0x20c   : > { %p2837_p6 = por %p2836_p5, %p2835_p0 }
 0x20e   : > { %p2838_p1 = pnand %p2837_p6, %p2831_p7 }
 0x210   : > { %2841 = shalt.err (!%p2838_p1)  }
 0x211   : > { %558 = dma.hbm_to_vmem [thread:$0]  %s549_s5, 48, %s556_s17, %s1763_s20, %s2998_s8, %s2998_s8, %s2999_s12 }
 0x212   : > { %s562_s30 = scalar_select %p561_p3, %s3537_s10, 0 }
 0x213   : > { %s580_s28 = sadd.s32 7, %s3379_s24  ;;  %s576_s23 = sshll.u32 %s1770_s9, 4  ;;  %s577_s23 = int_to_ptr.vmem [resolvable:$true] %s576_s23 }
 0x214   : > { %s3832_s30 = smov (!%p1944_p9, %s562_s30), 511  ;;  %s3580_s27 = sld [smem:[#allocation6 + %s580_s28]] }
 0x215   : > { %s565_s2 = sshrl.u32 %s3832_s30, 3  ;;  %s566_s14 = sand.u32 7, %s3832_s30  }
 0x216   : > { %s567_s15 = smul.u32 24, %s565_s2  ;;  %s1773_s22 = scalar_lea.sflag %s3392_s29, 6 [#allocation3] }
 0x218   : > { %s568_s3 = sadd.s32 %s567_s15, %s566_s14 }
 0x219   : > { %s1949_s19 = sshll.u32 %s568_s3, 4 }
 0x21a   : > { %s570_s17 = scalar_lea.hbm %s3705_s1, %s1949_s19  ;;  %p582_p3 = scmp.gt.s32.totalorder %s3580_s27, 0 }
 0x21b   : > { %s2842_s24 = scalar_lea.hbm %s570_s17, 48  ;;  %p2845_p9 = scmp.lt.u32.totalorder %s570_s17, %s3705_s1 }
 0x21c   : > { %p2843_p10 = scmp.ne.s32.totalorder %s570_s17, %s2842_s24  ;;  %p2846_p11 = scmp.lt.u32.totalorder %s3417_s18, %s2842_s24 }
 0x21d   : > { %p2848_p8 = scmp.lt.u32.totalorder %s2842_s24, %s570_s17 }
 0x21e   : > { %p2847_p4 = por %p2846_p11, %p2845_p9 }
 0x220   : > { %p2849_p12 = por %p2848_p8, %p2847_p4 }
 0x222   : > { %p2850_p2 = pnand %p2849_p12, %p2843_p10 }
 0x224   : > { %2853 = shalt.err (!%p2850_p2)  }
 0x225   : > { %s2854_s9 = scalar_lea.vmem %s577_s23, 48  ;;  %p2859_p7 = scmp.lt.s32.totalorder %s577_s23, %s3427_s6 }
 0x226   : > { %p2855_p13 = scmp.ne.s32.totalorder %s577_s23, %s2854_s9  ;;  %p2860_p0 = scmp.lt.s32.totalorder %s3430_s16, %s2854_s9 }
 0x228   : > { %p2861_p5 = por %p2860_p0, %p2859_p7 }
 0x22a   : > { %p2862_p6 = pnand %p2861_p5, %p2855_p13 }
 0x22c   : > { %2865 = shalt.err (!%p2862_p6)  }
 0x22d   : > { %579 = dma.hbm_to_vmem [thread:$0]  %s570_s17, 48, %s577_s23, %s1773_s22, %s2998_s8, %s2998_s8, %s2999_s12 }
 0x22e   : > { %s583_s5 = scalar_select %p582_p3, %s3580_s27, 0 }
 0x22f   : > { %p1951_p1 = scmp.lt.s32.totalorder %s3580_s27, 511  ;;  %s1780_s25 = scalar_lea.vmem %s3382_s21, 7 [#allocation2] }
 0x230   : > { %s597_s7 = sshll.u32 %s1780_s25, 4  ;;  %s1783_s2 = scalar_lea.sflag %s3392_s29, 7 [#allocation3]  ;;  %s598_s7 = int_to_ptr.vmem [resolvable:$true] %s597_s7 }
 0x231   : > { %s3834_s5 = smov (!%p1951_p1, %s583_s5), 511 }
 0x232   : > { %s586_s13 = sshrl.u32 %s3834_s5, 3  ;;  %s587_s30 = sand.u32 7, %s3834_s5  }
 0x233   : > { %s588_s28 = smul.u32 24, %s586_s13 }
 0x235   : > { %s589_s14 = sadd.s32 %s588_s28, %s587_s30 }
 0x236   : > { %s1956_s15 = sshll.u32 %s589_s14, 4 }
 0x237   : > { %s591_s0 = scalar_lea.hbm %s3705_s1, %s1956_s15 }
 0x238   : > { %s2866_s11 = scalar_lea.hbm %s591_s0, 48  ;;  %p2869_p3 = scmp.lt.u32.totalorder %s591_s0, %s3705_s1 }
 0x239   : > { %p2867_p10 = scmp.ne.s32.totalorder %s591_s0, %s2866_s11  ;;  %p2870_p9 = scmp.lt.u32.totalorder %s3417_s18, %s2866_s11 }
 0x23a   : > { %p2872_p4 = scmp.lt.u32.totalorder %s2866_s11, %s591_s0 }
 0x23b   : > { %p2871_p11 = por %p2870_p9, %p2869_p3 }
 0x23d   : > { %p2873_p8 = por %p2872_p4, %p2871_p11 }
 0x23f   : > { %p2874_p12 = pnand %p2873_p8, %p2867_p10 }
 0x241   : > { %2877 = shalt.err (!%p2874_p12)  }
 0x242   : > { %s2878_s21 = scalar_lea.vmem %s598_s7, 48  ;;  %p2883_p13 = scmp.lt.s32.totalorder %s598_s7, %s3427_s6 }
 0x243   : > { %p2879_p2 = scmp.ne.s32.totalorder %s598_s7, %s2878_s21  ;;  %p2884_p7 = scmp.lt.s32.totalorder %s3430_s16, %s2878_s21 }
 0x245   : > { %p2885_p0 = por %p2884_p7, %p2883_p13 }
 0x247   : > { %p2886_p5 = pnand %p2885_p0, %p2879_p2 }
 0x249   : > { %2889 = shalt.err (!%p2886_p5)  }
 0x24a   : > { %600 = dma.hbm_to_vmem [thread:$0]  %s591_s0, 48, %s598_s7, %s1783_s2, %s2998_s8, %s2998_s8, %s2999_s12 }
 0x24b PF: > { %v603_v1 = vld [vmem:[#allocation10 + $0x8] sm:$0xff]  ;;  %v606_v2 = vld [vmem:[#allocation10 + $0x20] sm:$0xff]  ;;  %v605_v5 = vld [vmem:[#allocation10 + $0x18] sm:$0xff]  ;;  %v3000_v8 = vmov 0.0   ;;  %v3001_v9 = vmov 0.0|0.0   ;;  %vm3002_vm0 = vmmov 0  }
 0x24c   : > { %v602_v3 = vld [vmem:[#allocation10] sm:$0xff]  ;;  %v2191_v4 = vpack.c.bf16 %v606_v2, %v603_v1  ;;  %v609_v6 = vld [vmem:[#allocation10 + $0x38] sm:$0xff]  ;;  %v612_v7 = vld [vmem:[#allocation10 + $0x50] sm:$0xff]  ;;  %731 = vmatprep.mubr.f32.mxu0 %v3000_v8  ;;  %2223 = vmatprep.subr.bf16.mxu1 %v3001_v9  ;;  %s2087_s29 = smul.u32 24, %s3814_s26  ;;  %s3766_s12 = sld [smem:[#allocation53_spill]] }
 0x24d   : > { %v2193_v10 = vpack.c.bf16 %v605_v5, %v602_v3  ;;  %v2195_v11 = vpack.c.bf16 %v612_v7, %v609_v6  ;;  %v608_v12 = vld [vmem:[#allocation10 + $0x30] sm:$0xff]  ;;  %v611_v13 = vld [vmem:[#allocation10 + $0x48] sm:$0xff]  ;;  %2168 = vmatprep.mubr.msk.f32.mxu1 %vm3002_vm0, %v3000_v8  ;;  %v618_v15 = vld [vmem:[#allocation10 + $0x80] sm:$0xff]  ;;  %s3767_s27 = sld [smem:[#allocation45_spill]]  ;;  %s3768_s17 = sld [smem:[#allocation50_spill]] }
 0x24e   : > { %v615_v14 = vld [vmem:[#allocation10 + $0x68] sm:$0xff]  ;;  %2192 = vmatprep.subr.bf16.mxu0 %v2191_v4  ;;  %v2197_v16 = vpack.c.bf16 %v611_v13, %v608_v12  ;;  %v614_v18 = vld [vmem:[#allocation10 + $0x60] sm:$0xff]  ;;  %v617_v19 = vld [vmem:[#allocation10 + $0x78] sm:$0xff]  ;;  %s3630_s26 = scalar_lea.vmem [#allocation2], %s2087_s29  ;;  %s3769_s24 = sld [smem:[#allocation42_spill]] }
 0x24f   : > { %2194 = vmatpush1.bf16.msra.mxu0 %v2193_v10  ;;  %v2199_v17 = vpack.c.bf16 %v618_v15, %v615_v14  ;;  %v621_v20 = vld [vmem:[#allocation10 + $0x98] sm:$0xff]  ;;  %v624_v21 = vld [vmem:[#allocation10 + $0xb0] sm:$0xff]  ;;  %v2201_v22 = vpack.c.bf16 %v617_v19, %v614_v18  ;;  %v623_v25 = vld [vmem:[#allocation10 + $0xa8] sm:$0xff]  ;;  %s3770_s10 = sld [smem:[#allocation48_spill]]  ;;  %s3004_s19 = smov [#allocation12]  }
 0x250   : > { %2196 = vmatprep.subr.bf16.mxu0 %v2195_v11  ;;  %v2203_v23 = vpack.c.bf16 %v624_v21, %v621_v20  ;;  %v620_v24 = vld [vmem:[#allocation10 + $0x90] sm:$0xff]  ;;  %v627_v26 = vld [vmem:[#allocation10 + $0xc8] sm:$0xff]  ;;  %v630_v27 = vld [vmem:[#allocation10 + $0xe0] sm:$0xff]  ;;  %s3772_s13 = sld [smem:[#allocation55_spill]]  ;;  %s2894_s0 = sshll.u32 %s3004_s19, 4  ;;  %s2895_s0 = int_to_ptr.vmem [resolvable:$false] %s2894_s0 }
 0x251   : > { %v626_v28 = vld [vmem:[#allocation10 + $0xc0] sm:$0xff]  ;;  %v2205_v29 = vpack.c.bf16 %v623_v25, %v620_v24  ;;  %v629_v30 = vld [vmem:[#allocation10 + $0xd8] sm:$0xff]  ;;  %v604_v31 = vld [vmem:[#allocation10 + $0x10] sm:$0xff]  ;;  %v2207_v33 = vpack.c.bf16 %v630_v27, %v627_v26  ;;  %s2896_s11 = scalar_lea.vmem %s2895_s0, 256 }
 0x252   : > { %v607_v32 = vld [vmem:[#allocation10 + $0x28] sm:$0xff]  ;;  %v633_v34 = vld [vmem:[#allocation10 + $0xf8] sm:$0xff]  ;;  %v636_v36 = vld [vmem:[#allocation10 + $0x110] sm:$0xff]  ;;  %v2209_v40 = vpack.c.bf16 %v629_v30, %v626_v28 }
 0x253   : > { %2198 = vmatpush1.bf16.msra.mxu0 %v2197_v16  ;;  %v2224_v35 = vpack.c.bf16 %v607_v32, %v604_v31  ;;  %v610_v37 = vld [vmem:[#allocation10 + $0x40] sm:$0xff]  ;;  %v613_v38 = vld [vmem:[#allocation10 + $0x58] sm:$0xff]  ;;  %v632_v41 = vld [vmem:[#allocation10 + $0xf0] sm:$0xff]  ;;  %v2211_v44 = vpack.c.bf16 %v636_v36, %v633_v34  ;;  %s2034_s20 = sshll.u32 %s3767_s27, 7  ;;  %s3771_s9 = scalar_lea.vmem [#allocation12], %s3768_s17 }
 0x254   : > { %2200 = vmatprep.subr.bf16.mxu0 %v2199_v17  ;;  %v2227_v39 = vpack.c.bf16 %v613_v38, %v610_v37  ;;  %v616_v42 = vld [vmem:[#allocation10 + $0x70] sm:$0xff]  ;;  %v619_v43 = vld [vmem:[#allocation10 + $0x88] sm:$0xff]  ;;  %v642_v47 = vld [vmem:[#allocation10 + $0x140] sm:$0xff]  ;;  %s1512_s5 = sshll.u32 %s3771_s9, 4  ;;  %s3774_s2 = smov %s3771_s9  ;;  %s3660_s5 = int_to_ptr.vmem [resolvable:$true] %s1512_s5 }
 0x255   : > { %2225 = vmatpush3.bf16.msra.mxu1 %v2224_v35  ;;  %v635_v45 = vld [vmem:[#allocation10 + $0x108] sm:$0xff]  ;;  %v2230_v48 = vpack.c.bf16 %v619_v43, %v616_v42  ;;  %v638_v50 = vld [vmem:[#allocation10 + $0x120] sm:$0xff]  ;;  %v625_v52 = vld [vmem:[#allocation10 + $0xb8] sm:$0xff]  ;;  %s3775_s14 = sand.u32 1, %s3769_s24   ;;  %s2890_s3 = scalar_lea.vmem %s3660_s5, 128 }
 0x256   : > { %2226 = vmatprep.subr.bf16.mxu1 %v3001_v9  ;;  %v639_v46 = vld [vmem:[#allocation10 + $0x128] sm:$0xff]  ;;  %v2213_v49 = vpack.c.bf16 %v635_v45, %v632_v41  ;;  %v622_v51 = vld [vmem:[#allocation10 + $0xa0] sm:$0xff]  ;;  %v641_v54 = vld [vmem:[#allocation10 + $0x138] sm:$0xff]  ;;  %s3773_s30 = smov %s3772_s13  ;;  %s3658_s28 = scalar_lea.hbm %s3772_s13, %s2034_s20 }
 0x257   : > { %2202 = vmatpush1.bf16.msra.mxu0 %v2201_v22  ;;  %v2215_v53 = vpack.c.bf16 %v642_v47, %v639_v46  ;;  %v645_v55 = vld [vmem:[#allocation10 + $0x158] sm:$0xff]  ;;  %v648_v56 = vld [vmem:[#allocation10 + $0x170] sm:$0xff]  ;;  %v2233_v57 = vpack.c.bf16 %v625_v52, %v622_v51  ;;  %v2217_v58 = vpack.c.bf16 %v641_v54, %v638_v50  ;;  %v631_v61 = vld [vmem:[#allocation10 + $0xe8] sm:$0xff]  ;;  %s1499_s15 = scalar_lea.sflag [#allocation9], %s3775_s14  ;;  %p2891_p6 = scmp.ne.s32.totalorder %s3660_s5, %s2890_s3 }
 0x258   : > { %2204 = vmatprep.subr.bf16.mxu0 %v2203_v23  ;;  %v644_v59 = vld [vmem:[#allocation10 + $0x150] sm:$0xff]  ;;  %v2219_v62 = vpack.c.bf16 %v648_v56, %v645_v55  ;;  %v647_v63 = vld [vmem:[#allocation10 + $0x168] sm:$0xff]  ;;  %v634_v1 = vld [vmem:[#allocation10 + $0x100] sm:$0xff]  ;;  %p3776_p1 = scmp.ne.s32.totalorder %s3770_s10, 0  ;;  %p2897_p9 = scmp.lt.s32.totalorder %s3660_s5, %s2895_s0 }
 0x259   : > { %2228 = vmatpush3.bf16.msra.mxu1 %v2227_v39  ;;  %v628_v60 = vld [vmem:[#allocation10 + $0xd0] sm:$0xff]  ;;  %v2221_v2 = vpack.c.bf16 %v647_v63, %v644_v59  ;;  %v637_v3 = vld [vmem:[#allocation10 + $0x118] sm:$0xff]  ;;  %v2334_v6 = vld [vmem:[#allocation7] ss:$12 sps:$4 sm:$0xff]   ;;  %p2898_p11 = scmp.lt.s32.totalorder %s2896_s11, %s2890_s3 }
 0x25a   : > { %2229 = vmatprep.subr.bf16.mxu1 %v3001_v9  ;;  %v2236_v0 = vpack.c.bf16 %v631_v61, %v628_v60  ;;  %v2336_v4 = vld [vmem:[#allocation7 + $0x4] ss:$12 sps:$4 sm:$0xff]   ;;  %v3622_v5 = vld [vmem:[#allocation4] sm:$0xff]  ;;  %v2239_v7 = vpack.c.bf16 %v637_v3, %v634_v1  ;;  %v643_v11 = vld [vmem:[#allocation10 + $0x148] sm:$0xff]  ;;  %p2892_p10 = pnand %p2891_p6, %p3776_p1 }
 0x25b   : > { %2206 = vmatpush1.bf16.msra.mxu0 %v2205_v29  ;;  %v640_v10 = vld [vmem:[#allocation10 + $0x130] sm:$0xff]  ;;  %v2339_v12 = vld [vmem:[#allocation7 + $0x1c] ss:$12 sps:$4 sm:$0xff]   ;;  %v2337_v13 = vld [vmem:[#allocation7 + $0x18] ss:$12 sps:$4 sm:$0xff]   ;;  %p2899_p4 = por %p2898_p11, %p2897_p9 }
 0x25c   : > { %2208 = vmatprep.subr.bf16.mxu0 %v2207_v33  ;;  %v2242_v14 = vpack.c.bf16 %v643_v11, %v640_v10  ;;  %v646_v15 = vld [vmem:[#allocation10 + $0x160] sm:$0xff]  ;;  %v649_v16 = vld [vmem:[#allocation10 + $0x178] sm:$0xff]  ;;  %v2361_v20 = vld [vmem:[#allocation7 + $0xc8] ss:$12 sps:$4 sm:$0xff]   ;;  %p2893_p3 = pneg %p2892_p10 }
 0x25d   : > { %2231 = vmatpush3.bf16.msra.mxu1 %v2230_v48  ;;  %v2342_v17 = vld [vmem:[#allocation7 + $0x34] ss:$12 sps:$4 sm:$0xff]   ;;  %v2245_v18 = vpack.c.bf16 %v649_v16, %v646_v15  ;;  %v2340_v19 = vld [vmem:[#allocation7 + $0x30] ss:$12 sps:$4 sm:$0xff]   ;;  %v2345_v21 = vld [vmem:[#allocation7 + $0x4c] ss:$12 sps:$4 sm:$0xff]  }
 0x25e   : > { %2232 = vmatprep.subr.bf16.mxu1 %v3001_v9  ;;  %v2343_v22 = vld [vmem:[#allocation7 + $0x48] ss:$12 sps:$4 sm:$0xff]   ;;  %v2366_v24 = vld [vmem:[#allocation7 + $0xe0] ss:$12 sps:$4 sm:$0xff]   ;;  %v2348_v25 = vld [vmem:[#allocation7 + $0x64] ss:$12 sps:$4 sm:$0xff]   ;;  %p2900_p8 = pnand %p2899_p4, %p2893_p3 }
 0x25f   : > { %2210 = vmatpush1.bf16.msra.mxu0 %v2209_v40  ;;  %v2365_v23 = vld [vmem:[#allocation7 + $0x8] ss:$12 sps:$4 sm:$0xff]   ;;  %v2346_v26 = vld [vmem:[#allocation7 + $0x60] ss:$12 sps:$4 sm:$0xff]   ;;  %v2349_v29 = vld [vmem:[#allocation7 + $0x78] ss:$12 sps:$4 sm:$0xff]  }
 0x260   : > { %2212 = vmatprep.subr.bf16.mxu0 %v2211_v44  ;;  %v2370_v27 = vld [vmem:[#allocation7 + $0x20] ss:$12 sps:$4 sm:$0xff]   ;;  %v2351_v28 = vld [vmem:[#allocation7 + $0x7c] ss:$12 sps:$4 sm:$0xff]   ;;  %v2375_v30 = vld [vmem:[#allocation7 + $0x38] ss:$12 sps:$4 sm:$0xff]  }
 0x261   : > { %2234 = vmatpush3.bf16.msra.mxu1 %v2233_v57  ;;  %v2376_v31 = vld [vmem:[#allocation7 + $0x110] ss:$12 sps:$4 sm:$0xff]   ;;  %v2354_v33 = vld [vmem:[#allocation7 + $0x94] ss:$12 sps:$4 sm:$0xff]   ;;  %v2357_v38 = vld [vmem:[#allocation7 + $0xac] ss:$12 sps:$4 sm:$0xff]  }
 0x262   : > { %2235 = vmatprep.subr.bf16.mxu1 %v3001_v9  ;;  %v812_v32 = vld [vmem:[%s3630_s26 + $0x8] sm:$0xff]  ;;  %v2391_v45 = vld [vmem:[#allocation7 + $0x158] ss:$12 sps:$4 sm:$0xff]   ;;  %v3003_v16 = vmov 0  }
 0x263   : > { %2214 = vmatpush1.bf16.msra.mxu0 %v2213_v49  ;;  %v815_v34 = vpack.c.bf16 %v812_v32, %v812_v32  ;;  %v2380_v35 = vld [vmem:[#allocation7 + $0x50] ss:$12 sps:$4 sm:$0xff]   ;;  %v2381_v37 = vld [vmem:[#allocation7 + $0x128] ss:$12 sps:$4 sm:$0xff]   ;;  %v2386_v41 = vld [vmem:[#allocation7 + $0x140] ss:$12 sps:$4 sm:$0xff]  }
 0x264   : > { %2216 = vmatprep.subr.bf16.mxu0 %v2215_v53  ;;  %v2352_v36 = vld [vmem:[#allocation7 + $0x90] ss:$12 sps:$4 sm:$0xff]   ;;  %v2355_v39 = vld [vmem:[#allocation7 + $0xa8] ss:$12 sps:$4 sm:$0xff]   ;;  %v2358_v43 = vld [vmem:[#allocation7 + $0xc0] ss:$12 sps:$4 sm:$0xff]  }
 0x265   : > { %2237 = vmatpush3.bf16.msra.mxu1 %v2236_v0  ;;  %v2385_v40 = vld [vmem:[#allocation7 + $0x68] ss:$12 sps:$4 sm:$0xff]   ;;  %v2360_v42 = vld [vmem:[#allocation7 + $0xc4] ss:$12 sps:$4 sm:$0xff]   ;;  %v2390_v44 = vld [vmem:[#allocation7 + $0x80] ss:$12 sps:$4 sm:$0xff]  }
 0x266   : > { %2238 = vmatprep.subr.bf16.mxu1 %v3001_v9  ;;  %v2364_v46 = vld [vmem:[#allocation7 + $0xdc] ss:$12 sps:$4 sm:$0xff]   ;;  %v2395_v47 = vld [vmem:[#allocation7 + $0x98] ss:$12 sps:$4 sm:$0xff]   ;;  %v2369_v50 = vld [vmem:[#allocation7 + $0xf4] ss:$12 sps:$4 sm:$0xff]  }
 0x267   : > { %2218 = vmatpush1.bf16.msra.mxu0 %v2217_v58  ;;  %v2362_v48 = vld [vmem:[#allocation7 + $0xd8] ss:$12 sps:$4 sm:$0xff]   ;;  %v2396_v49 = vld [vmem:[#allocation7 + $0x170] ss:$12 sps:$4 sm:$0xff]   ;;  %v2404_v55 = vld [vmem:[#allocation7 + $0x188] ss:$12 sps:$4 sm:$0xff]  }
 0x268   : > { %2220 = vmatprep.subr.bf16.mxu0 %v2219_v62  ;;  %v2400_v51 = vld [vmem:[#allocation7 + $0xb0] ss:$12 sps:$4 sm:$0xff]   ;;  %v2374_v53 = vld [vmem:[#allocation7 + $0x10c] ss:$12 sps:$4 sm:$0xff]   ;;  %v2372_v56 = vld [vmem:[#allocation7 + $0x108] ss:$12 sps:$4 sm:$0xff]  }
 0x269   : > { %2240 = vmatpush3.bf16.msra.mxu1 %v2239_v7  ;;  %v2367_v52 = vld [vmem:[#allocation7 + $0xf0] ss:$12 sps:$4 sm:$0xff]   ;;  %v811_v54 = vld [vmem:[%s3630_s26] sm:$0xff] }
 0x26a   : > { %2241 = vmatprep.subr.bf16.mxu1 %v3001_v9  ;;  %v814_v57 = vpack.c.bf16 %v811_v54, %v811_v54  ;;  %v2379_v58 = vld [vmem:[#allocation7 + $0x124] ss:$12 sps:$4 sm:$0xff]   ;;  %v2408_v59 = vld [vmem:[#allocation7 + $0x1a0] ss:$12 sps:$4 sm:$0xff]   ;;  %v2384_v61 = vld [vmem:[#allocation7 + $0x13c] ss:$12 sps:$4 sm:$0xff]  }
 0x26b   : > { %2222 = vmatpush1.bf16.msra.mxu0 %v2221_v2  ;;  %v2377_v60 = vld [vmem:[#allocation7 + $0x120] ss:$12 sps:$4 sm:$0xff]   ;;  %v2412_v62 = vld [vmem:[#allocation7 + $0x1b8] ss:$12 sps:$4 sm:$0xff]   ;;  %v2416_v1 = vld [vmem:[#allocation7 + $0x1d0] ss:$12 sps:$4 sm:$0xff]  }
 0x26c   : > { %1314 = vmatprep.subr.bf16.mxu0 %v2336_v4  ;;  %v2382_v63 = vld [vmem:[#allocation7 + $0x138] ss:$12 sps:$4 sm:$0xff]   ;;  %v2389_v0 = vld [vmem:[#allocation7 + $0x154] ss:$12 sps:$4 sm:$0xff]   ;;  %v2387_v2 = vld [vmem:[#allocation7 + $0x150] ss:$12 sps:$4 sm:$0xff]  }
 0x26d   : > { %2243 = vmatpush3.bf16.msra.mxu1 %v2242_v14  ;;  %v2394_v3 = vld [vmem:[#allocation7 + $0x16c] ss:$12 sps:$4 sm:$0xff]   ;;  %v2420_v4 = vld [vmem:[#allocation7 + $0x1e8] ss:$12 sps:$4 sm:$0xff]   ;;  %v2399_v7 = vld [vmem:[#allocation7 + $0x184] ss:$12 sps:$4 sm:$0xff]  }
 0x26e   : > { %732 = vmatmul.mubr.f32.vlgmr.msra.gmra.mrb[0].mxu0 %v3622_v5  ;;  %2244 = vmatprep.subr.bf16.mxu1 %v3001_v9  ;;  %v2371_v9 = vld [vmem:[#allocation7 + $0xf8] ss:$12 sps:$4 sm:$0xff]   ;;  %v2424_v10 = vld [vmem:[#allocation7 + $0x200] ss:$12 sps:$4 sm:$0xff]  }
 0x26f   : > { %1315 = vmatpush1.bf16.msra.mxu0 %v2334_v6  ;;  %1346 = vmatprep.mubr.bf16.mxu0 %v815_v34  ;;  %v2392_v6 = vld [vmem:[#allocation7 + $0x168] ss:$12 sps:$4 sm:$0xff]   ;;  %v2397_v11 = vld [vmem:[#allocation7 + $0x180] ss:$12 sps:$4 sm:$0xff]   ;;  %v2401_v14 = vld [vmem:[#allocation7 + $0x198] ss:$12 sps:$4 sm:$0xff]  }
 0x270   : > { %1316 = vmatprep.subr.bf16.mxu0 %v2339_v12  ;;  %v2403_v12 = vld [vmem:[#allocation7 + $0x19c] ss:$12 sps:$4 sm:$0xff]   ;;  %v2407_v15 = vld [vmem:[#allocation7 + $0x1b4] ss:$12 sps:$4 sm:$0xff]  }
 0x271   : > { %2246 = vmatpush3.bf16.msra.mxu1 %v2245_v18  ;;  %v2405_v18 = vld [vmem:[#allocation7 + $0x1b0] ss:$12 sps:$4 sm:$0xff]  }
 0x272   : > { %2105 = vmatprep.subr.bf16.mxu1 %v2361_v20  ;;  %v813_v20 = vld [vmem:[%s3630_s26 + $0x10] sm:$0xff] }
 0x273   : > { %1317 = vmatpush1.bf16.msra.mxu0 %v2337_v13  ;;  %v2428_v13 = vld [vmem:[#allocation7 + $0x218] ss:$12 sps:$4 sm:$0xff]  }
 0x274   : > { %1318 = vmatprep.subr.bf16.mxu0 %v2342_v17  ;;  %2169 = vmatmul.mubr.f32.vlgmr.msra.gmra.mrb[0].mxu1 %v3622_v5  ;;  %v2429_v17 = vld [vmem:[#allocation7 + $0x230] ss:$12 sps:$4 sm:$0xff]  }
 0x275   : > { %2106 = vmatpush3.bf16.msra.mxu1 %v2365_v23  ;;  %1428 = vmatprep.mubr.bf16.mxu1 %v815_v34  ;;  %v2415_v23 = vld [vmem:[#allocation7 + $0x1e4] ss:$12 sps:$4 sm:$0xff]  }
 0x276   : > { %2107 = vmatprep.subr.bf16.mxu1 %v2366_v24  ;;  %v2413_v24 = vld [vmem:[#allocation7 + $0x1e0] ss:$12 sps:$4 sm:$0xff]  }
 0x277   : > { %1319 = vmatpush1.bf16.msra.mxu0 %v2340_v19  ;;  %v2411_v19 = vld [vmem:[#allocation7 + $0x1cc] ss:$12 sps:$4 sm:$0xff]  }
 0x278   : > { %1320 = vmatprep.subr.bf16.mxu0 %v2345_v21  ;;  %v2409_v21 = vld [vmem:[#allocation7 + $0x1c8] ss:$12 sps:$4 sm:$0xff]  }
 0x279   : > { %2108 = vmatpush3.bf16.msra.mxu1 %v2370_v27  ;;  %v2423_v27 = vld [vmem:[#allocation7 + $0x214] ss:$12 sps:$4 sm:$0xff]  }
 0x27a   : > { %2109 = vmatprep.subr.bf16.mxu1 %v2371_v9  ;;  %v2427_v9 = vld [vmem:[#allocation7 + $0x22c] ss:$12 sps:$4 sm:$0xff]  }
 0x27b   : > { %1321 = vmatpush1.bf16.msra.mxu0 %v2343_v22  ;;  %v816_v22 = vpack.c.bf16 %v813_v20, %v813_v20 }
 0x27c   : > { %1322 = vmatprep.subr.bf16.mxu0 %v2348_v25  ;;  %v2419_v25 = vld [vmem:[#allocation7 + $0x1fc] ss:$12 sps:$4 sm:$0xff]  }
 0x27d   : > { %2110 = vmatpush3.bf16.msra.mxu1 %v2375_v30 }
 0x27e   : > { %2111 = vmatprep.subr.bf16.mxu1 %v2376_v31 }
 0x27f   : > { %1323 = vmatpush1.bf16.msra.mxu0 %v2346_v26  ;;  %v2417_v26 = vld [vmem:[#allocation7 + $0x1f8] ss:$12 sps:$4 sm:$0xff]  }
 0x280   : > { %1324 = vmatprep.subr.bf16.mxu0 %v2351_v28  ;;  %v2425_v28 = vld [vmem:[#allocation7 + $0x228] ss:$12 sps:$4 sm:$0xff]  }
 0x281   : > { %2112 = vmatpush3.bf16.msra.mxu1 %v2380_v35 }
 0x282   : > { %2113 = vmatprep.subr.bf16.mxu1 %v2381_v37 }
 0x283   : > { %1325 = vmatpush1.bf16.msra.mxu0 %v2349_v29 }
 0x284   : > { %1326 = vmatprep.subr.bf16.mxu0 %v2354_v33 }
 0x285   : > { %2114 = vmatpush3.bf16.msra.mxu1 %v2385_v40  ;;  %v913_v40 = vld [vmem:[%s3708_s4] sm:$0x7] }
 0x286   : > { %2115 = vmatprep.subr.bf16.mxu1 %v2386_v41 }
 0x287   : > { %1327 = vmatpush1.bf16.msra.mxu0 %v2352_v36 }
 0x288   : > { %1328 = vmatprep.subr.bf16.mxu0 %v2357_v38  ;;  %v652_v38 = vlaneseq }
 0x289   : > { %2116 = vmatpush3.bf16.msra.mxu1 %v2390_v44 }
 0x28a   : > { %2117 = vmatprep.subr.bf16.mxu1 %v2391_v45 }
 0x28b   : > { %1329 = vmatpush1.bf16.msra.mxu0 %v2355_v39  ;;  %v653_v39 = vshrl.u32 %v652_v38, 7 }
 0x28c   : > { %1330 = vmatprep.subr.bf16.mxu0 %v2360_v42 }
 0x28d   : > { %2118 = vmatpush3.bf16.msra.mxu1 %v2395_v47  ;;  %v662_v41 = vsub.s32 2, %v653_v39 }
 0x28e   : > { %2119 = vmatprep.subr.bf16.mxu1 %v2396_v49  ;;  %v654_v49 = vsub.s32 0, %v653_v39 }
 0x28f   : > { %1331 = vmatpush1.bf16.msra.mxu0 %v2358_v43  ;;  %v926_v42 = vrot.slane %v913_v40, %v662_v41 }
 0x290   : > { %1332 = vmatprep.subr.bf16.mxu0 %v2364_v46 }
 0x291   : > { %2120 = vmatpush3.bf16.msra.mxu1 %v2400_v51  ;;  %v658_v51 = vsub.s32 1, %v653_v39 }
 0x292   : > { %2171 = vmatprep.subr.bf16.mxu1 %v3000_v8 }
 0x293   : > { %1333 = vmatpush1.bf16.msra.mxu0 %v2362_v48 }
 0x294   : > { %1334 = vmatprep.subr.bf16.mxu0 %v2369_v50  ;;  %1429 = vmatmul.mubr.bf16.vlgmr.msra.gmra.mrb[4].mxu1 %v814_v57  ;;  %v650_v50 = vld [vmem:[%s3766_s12] sm:$0x7] }
 0x295   : > { %2172 = vmatpush3.bf16.msra.mxu1 %v2404_v55  ;;  %2187 = vmatprep.mubr.msk.bf16.mxu1 %vm3002_vm0, %v3000_v8  ;;  %v659_v54 = vrot.slane %v650_v50, %v658_v51  ;;  %v922_v55 = vrot.slane %v913_v40, %v658_v51 }
 0x296   : > { %2173 = vmatprep.subr.bf16.mxu1 %v3000_v8 }
 0x297   : > { %1335 = vmatpush1.bf16.msra.mxu0 %v2367_v52  ;;  %v655_v52 = vrot.slane %v650_v50, %v654_v49 }
 0x298   : > { %1336 = vmatprep.subr.bf16.mxu0 %v2374_v53  ;;  %v918_v53 = vrot.slane %v913_v40, %v654_v49 }
 0x299   : > { %2174 = vmatpush3.bf16.msra.mxu1 %v2408_v59 }
 0x29a   : > { %2175 = vmatprep.subr.bf16.mxu1 %v3000_v8 }
 0x29b   : > { %1337 = vmatpush1.bf16.msra.mxu0 %v2372_v56 }
 0x29c   : > { %1338 = vmatprep.subr.bf16.mxu0 %v2379_v58 }
 0x29d   : > { %2176 = vmatpush3.bf16.msra.mxu1 %v2412_v62 }
 0x29e   : > { %2177 = vmatprep.subr.bf16.mxu1 %v3000_v8 }
 0x29f   : > { %1339 = vmatpush1.bf16.msra.mxu0 %v2377_v60 }
 0x2a0   : > { %1340 = vmatprep.subr.bf16.mxu0 %v2384_v61 }
 0x2a1   : > { %2178 = vmatpush3.bf16.msra.mxu1 %v2416_v1 }
 0x2a2   : > { %2179 = vmatprep.subr.bf16.mxu1 %v3000_v8 }
 0x2a3   : > { %1341 = vmatpush1.bf16.msra.mxu0 %v2382_v63 }
 0x2a4   : > { %1342 = vmatprep.subr.bf16.mxu0 %v2389_v0 }
 0x2a5   : > { %2180 = vmatpush3.bf16.msra.mxu1 %v2420_v4 }
 0x2a6   : > { %2181 = vmatprep.subr.bf16.mxu1 %v3000_v8 }
 0x2a7   : > { %1343 = vmatpush1.bf16.msra.mxu0 %v2387_v2 }
 0x2a8   : > { %1344 = vmatprep.subr.bf16.mxu0 %v2394_v3 }
 0x2a9   : > { %2182 = vmatpush3.bf16.msra.mxu1 %v2424_v10 }
 0x2aa   : > { %2183 = vmatprep.subr.bf16.mxu1 %v3000_v8 }
 0x2ab   : > { %1345 = vmatpush1.bf16.msra.mxu0 %v2392_v6 }
 0x2ac   : > { %1355 = vmatprep.subr.bf16.mxu0 %v2399_v7  ;;  %v663_v7 = vrot.slane %v650_v50, %v662_v41 }
 0x2ad   : > { %2184 = vmatpush3.bf16.msra.mxu1 %v2428_v13 }
 0x2ae   : > { %1347 = vmatmul.mubr.bf16.vlgmr.msra.gmra.mrb[4].mxu0 %v814_v57  ;;  %2185 = vmatprep.subr.bf16.mxu1 %v3000_v8  ;;  %v2421_v8 = vld [vmem:[#allocation7 + $0x210] ss:$12 sps:$4 sm:$0xff]  }
 0x2af   : > { %1356 = vmatpush1.bf16.msra.mxu0 %v2397_v11  ;;  %1387 = vmatprep.mubr.bf16.mxu0 %v3003_v16 }
 0x2b0   : > { %1357 = vmatprep.subr.bf16.mxu0 %v2403_v12 }
 0x2b1   : > { %2186 = vmatpush3.bf16.msra.mxu1 %v2429_v17 }
 0x2b3   : > { %1358 = vmatpush1.bf16.msra.mxu0 %v2401_v14 }
 0x2b4   : > { %1359 = vmatprep.subr.bf16.mxu0 %v2407_v15  ;;  %2188 = vmatmul.mubr.bf16.vlgmr.msra.gmra.mrb[8].mxu1 %v816_v22 }
 0x2b7   : > { %1360 = vmatpush1.bf16.msra.mxu0 %v2405_v18 }
 0x2b8   : > { %1361 = vmatprep.subr.bf16.mxu0 %v2411_v19 }
 0x2bb   : > { %1362 = vmatpush1.bf16.msra.mxu0 %v2409_v21 }
 0x2bc   : > { %1363 = vmatprep.subr.bf16.mxu0 %v2415_v23 }
 0x2bf   : > { %1364 = vmatpush1.bf16.msra.mxu0 %v2413_v24 }
 0x2c0   : > { %1365 = vmatprep.subr.bf16.mxu0 %v2419_v25 }
 0x2c3   : > { %1366 = vmatpush1.bf16.msra.mxu0 %v2417_v26 }
 0x2c4   : > { %1367 = vmatprep.subr.bf16.mxu0 %v2423_v27 }
 0x2c7   : > { %1368 = vmatpush1.bf16.msra.mxu0 %v2421_v8 }
 0x2c8   : > { %1369 = vmatprep.subr.bf16.mxu0 %v2427_v9 }
 0x2cb   : > { %1370 = vmatpush1.bf16.msra.mxu0 %v2425_v28 }
 0x2ce   : > { %1388 = vmatmul.mubr.bf16.vlgmr.msra.gmra.mrb[4].mxu0 %v816_v22 }
 0x341   : > { %v733_v29 = vpop.f32.mrb[0].mxu0 }
 0x342   : > { %v735_v30 = vpop.f32.mrb[1].mxu0  ;;  %v734_v57 = vadd.f32 %v733_v29, %v655_v52 }
 0x343   : > { %v736_v60 = vadd.f32 %v735_v30, %v659_v54 }
 0x347   : > { %v804_v31 = vpop.f32.mrb[0].mxu1 }
 0x348   : > { %v2170_v32 = vpop.f32.mrb[1].mxu1  ;;  %v805_v11 = vadd.f32 %v804_v31, %v663_v7 }
 0x367   : > { %v2121_v33 = vpop.f32.mrb[4].mxu1 }
 0x368   : > { %v2122_v34 = vpop.f32.mrb[5].mxu1 }
 0x369   : > { %v2123_v35 = vadd.f32 %v2122_v34, %v2121_v33  ;;  %v2124_v36 = vpop.f32.mrb[6].mxu1 }
 0x36a   : > { %v2125_v37 = vpop.f32.mrb[7].mxu1 }
 0x36b   : > { %v1431_v43 = vadd.f32 %v2123_v35, %v926_v42 }
 0x387   : > { %v1470_v44 = vpop.f32.mrb[8].mxu1 }
 0x388   : > { %v1471_v45 = vadd.f32 %v1470_v44, %v1431_v43  ;;  %v2189_v46 = vpop.f32.mrb[9].mxu1 }
 0x389   : > { %v1473_v47 = vpop.f32.mrb[10].mxu1 }
 0x38a   : > { %v2190_v48 = vpop.f32.mrb[11].mxu1 }
 0x3a1   : > { %v1389_v56 = vpop.f32.mrb[4].mxu0 }
 0x3a2   : > { %v2247_v58 = vadd.f32 %v1389_v56, %v918_v53  ;;  %v1391_v59 = vpop.f32.mrb[5].mxu0 }
 0x3a3   : > { %v2248_v61 = vadd.f32 %v1391_v59, %v922_v55  ;;  %v1393_v62 = vpop.f32.mrb[6].mxu0 }
 0x3a4   : > { %v1476_v63 = vadd.f32 %v2247_v58, %v734_v57  ;;  %v1394_v0 = vpop.f32.mrb[7].mxu0 }
 0x3a5   : > { %v1483_v1 = vadd.f32 %v2248_v61, %v736_v60 }
 0x3a6   : > { %v2031_v2 = vmul.f32 -1.442695, %v1476_v63 }
 0x3a7   : > { %v2032_v3 = vmul.f32 -1.442695, %v1483_v1 }
 0x3a8   : > { %2430 = vpow2.f32 %v2031_v2 }
 0x3a9   : > { %2432 = vpow2.f32 %v2032_v3 }
 0x3b2   : > { %v2431_v4 = vpop.eup %2430 }
 0x3b3   : > { %v1480_v6 = vadd.f32 1.0, %v2431_v4  ;;  %v2433_v10 = vpop.eup %2432 }
 0x3b4   : > { %v1487_v14 = vadd.f32 1.0, %v2433_v10 }
 0x3b5   : > { %2434 = vrcp.f32 %v1480_v6 }
 0x3bf   : > { %v2435_v12 = vpop.eup %2434 }
 0x3c0   : > { %v1490_v13 = vmul.f32 %v2435_v12, %v805_v11 }
 0x3c2   : > { %v1491_v15 = vadd.f32 %v1490_v13, %v1471_v45 }
 0x3c4   : > { %2436 = vtanh.f32 %v1491_v15 }
 0x3c5   : > { %2438 = vrcp.f32 %v1487_v14 }
 0x3ce   : > { %v2437_v16 = vpop.eup %2436 }
 0x3cf   : > { %v1493_v17 = vsub.f32 %v3622_v5, %v2437_v16  ;;  %v2439_v18 = vpop.eup %2438 }
 0x3d1   : > { %v1494_v19 = vmul.f32 %v2439_v18, %v1493_v17 }
 0x3d3   : > { %v1495_v20 = vadd.f32 %v2437_v16, %v1494_v19 }
 0x3d5   : > { %1496 = vst [vmem:[#allocation4] sm:$0xff] %v1495_v20  ;;  %1497 = vst [vmem:[%s3774_s2] sm:$0xff] %v1495_v20 }
 0x3d6   : > { %2903 = shalt.err (!%p2900_p8)
}
 0x3d7   : > { %s2904_s23 = scalar_lea.hbm %s3658_s28, 128  ;;  %s2908_s29 = scalar_lea.hbm %s3773_s30, 768 }
 0x3d8   : > { %p2905_p12 = scmp.ne.s32.totalorder %s3658_s28, %s2904_s23  ;;  %p2909_p7 = scmp.lt.u32.totalorder %s3658_s28, %s3773_s30 }
 0x3d9   : > { %p2910_p0 = scmp.lt.u32.totalorder %s2908_s29, %s2904_s23  ;;  %p2912_p6 = scmp.lt.u32.totalorder %s2904_s23, %s3658_s28 }
 0x3da   : > { %p2906_p2 = pnand %p2905_p12, %p3776_p1 }
 0x3db   : > { %p2911_p5 = por %p2910_p0, %p2909_p7 }
 0x3dc   : > { %p2907_p13 = pneg %p2906_p2 }
 0x3dd   : > { %p2913_p10 = por %p2912_p6, %p2911_p5 }
 0x3df   : > { %p2914_p3 = pnand %p2913_p10, %p2907_p13 }
 0x3e1   : > { %2917 = shalt.err (!%p2914_p3)
}
 0x3e2   : > { %2261 = dma.vmem_to_hbm [thread:$0]  (%p3776_p1), %s3660_s5, 128, %s3658_s28, %s1499_s15  }
 0x3e3 PF: > { %s3777_s6 = sld [smem:[#allocation44_spill]]  ;;  %s3778_s16 = sld [smem:[#allocation41_spill]] }
 0x3e4   : > { %s3779_s8 = sld [smem:[#allocation49_spill]] }
 0x3e9   : > { %p2278_p9 = scmp.ge.s32.totalorder %s3777_s6, 2  ;;  %s1524_s12 = sand.u32 1, %s3778_s16  }
 0x3ea   : > { %p3780_p11 = scmp.ne.s32.totalorder %s3779_s8, 0  ;;  %s1525_s27 = scalar_lea.sflag [#allocation9], %s1524_s12 }
 0x3ec   : > { %p2271_p4 = pnand %p2278_p9, %p3780_p11 }
 0x3ee   : > { %2961 = dma.done.wait (!%p2271_p4), %s1525_s27, 128  }
 0x3ef   : > { %2963 = vsyncadd (!%p2271_p4), %s1525_s27, 4294967168  ;;  %s3781_s14 = sld [smem:[#allocation46_spill]]  ;;  %s3782_s11 = sld [smem:[#allocation42_spill]] }
 0x3f0   : > { %s3783_s12 = sld [smem:[#allocation43_spill]]  ;;  %s3784_s13 = sld [smem:[#allocation47_spill]] }
 0x3f5   : > { %p23_p8 = scmp.ge.s32.totalorder %s3781_s14, 8  }
 0x3f7   :  { %25 = sbr.rel (!%p23_p8) target bundleno = 18 (0x12), region = 159 }
 0x3fe   :  { %1530 = vsyncpa [#allocation8], 1 }
 0x3ff   :  { %1532 = vsyncpa [#allocation8 + $0x1], 1 }
 0x400   :  { %1533 = vsyncpa [#allocation11], 1 }
 0x401   :  { %1534 = vsyncpa [#allocation9], 1 }
 0x402   :  { %1536 = vsyncpa [#allocation9 + $0x1], 1 }
 0x403   :  { %1537 = vsyncmov [#allocation3] }
 0x406   :  { %s1538_s17 = vpop.sfrf %1537 }
 0x407   :  { %p2037_p1 = scmp.ne.s32.totalorder %s1538_s17, 0 }
 0x409   :  { %1542 = shalt.err (%p2037_p1)  }
 0x40a   :  { %1544 = vsyncmov [#allocation3 + $0x1] }
 0x40d   :  { %s1545_s24 = vpop.sfrf %1544 }
 0x40e   :  { %p2038_p12 = scmp.ne.s32.totalorder %s1545_s24, 0 }
 0x410   :  { %1549 = shalt.err (%p2038_p12)  }
 0x411   :  { %1551 = vsyncmov [#allocation3 + $0x2] }
 0x414   :  { %s1552_s10 = vpop.sfrf %1551 }
 0x415   :  { %p2039_p2 = scmp.ne.s32.totalorder %s1552_s10, 0 }
 0x417   :  { %1556 = shalt.err (%p2039_p2)  }
 0x418   :  { %1558 = vsyncmov [#allocation3 + $0x3] }
 0x41b   :  { %s1559_s20 = vpop.sfrf %1558 }
 0x41c   :  { %p2040_p13 = scmp.ne.s32.totalorder %s1559_s20, 0 }
 0x41e   :  { %1563 = shalt.err (%p2040_p13)  }
 0x41f   :  { %1565 = vsyncmov [#allocation3 + $0x4] }
 0x422   :  { %s1566_s1 = vpop.sfrf %1565 }
 0x423   :  { %p2041_p7 = scmp.ne.s32.totalorder %s1566_s1, 0 }
 0x425   :  { %1570 = shalt.err (%p2041_p7)  }
 0x426   :  { %1572 = vsyncmov [#allocation3 + $0x5] }
 0x429   :  { %s1573_s4 = vpop.sfrf %1572 }
 0x42a   :  { %p2042_p0 = scmp.ne.s32.totalorder %s1573_s4, 0 }
 0x42c   :  { %1577 = shalt.err (%p2042_p0)  }
 0x42d   :  { %1579 = vsyncmov [#allocation3 + $0x6] }
 0x430   :  { %s1580_s9 = vpop.sfrf %1579 }
 0x431   :  { %p2043_p5 = scmp.ne.s32.totalorder %s1580_s9, 0 }
 0x433   :  { %1584 = shalt.err (%p2043_p5)  }
 0x434   :  { %1586 = vsyncmov [#allocation3 + $0x7] }
 0x437   :  { %s1587_s5 = vpop.sfrf %1586 }
 0x438   :  { %p2044_p6 = scmp.ne.s32.totalorder %s1587_s5, 0 }
 0x43a   :  { %1591 = shalt.err (%p2044_p6)  }
 0x43b   :  { %1593 = vsyncmov [#allocation3 + $0x8] }
 0x43e   :  { %s1594_s25 = vpop.sfrf %1593 }
 0x43f   :  { %p2045_p10 = scmp.ne.s32.totalorder %s1594_s25, 0 }
 0x441   :  { %1598 = shalt.err (%p2045_p10)  }
 0x442   :  { %1600 = vsyncmov [#allocation3 + $0x9] }
 0x445   :  { %s1601_s7 = vpop.sfrf %1600 }
 0x446   :  { %p2046_p3 = scmp.ne.s32.totalorder %s1601_s7, 0 }
 0x448   :  { %1605 = shalt.err (%p2046_p3)  }
 0x449   :  { %1607 = vsyncmov [#allocation3 + $0xa] }
 0x44c   :  { %s1608_s13 = vpop.sfrf %1607 }
 0x44d   :  { %p2047_p9 = scmp.ne.s32.totalorder %s1608_s13, 0 }
 0x44f   :  { %1612 = shalt.err (%p2047_p9)  }
 0x450   :  { %1614 = vsyncmov [#allocation3 + $0xb] }
 0x453   :  { %s1615_s30 = vpop.sfrf %1614 }
 0x454   :  { %p2048_p11 = scmp.ne.s32.totalorder %s1615_s30, 0 }
 0x456   :  { %1619 = shalt.err (%p2048_p11)  }
 0x457   :  { %1621 = vsyncmov [#allocation3 + $0xc] }
 0x45a   :  { %s1622_s28 = vpop.sfrf %1621 }
 0x45b   :  { %p2049_p4 = scmp.ne.s32.totalorder %s1622_s28, 0 }
 0x45d   :  { %1626 = shalt.err (%p2049_p4)  }
 0x45e   :  { %1628 = vsyncmov [#allocation3 + $0xd] }
 0x461   :  { %s1629_s2 = vpop.sfrf %1628 }
 0x462   :  { %p2050_p8 = scmp.ne.s32.totalorder %s1629_s2, 0 }
 0x464   :  { %1633 = shalt.err (%p2050_p8)  }
 0x465   :  { %1635 = vsyncmov [#allocation3 + $0xe] }
 0x468   :  { %s1636_s14 = vpop.sfrf %1635 }
 0x469   :  { %p2051_p1 = scmp.ne.s32.totalorder %s1636_s14, 0 }
 0x46b   :  { %1640 = shalt.err (%p2051_p1)  }
 0x46c   :  { %1642 = vsyncmov [#allocation3 + $0xf] }
 0x46f   :  { %s1643_s15 = vpop.sfrf %1642 }
 0x470   :  { %p2052_p12 = scmp.ne.s32.totalorder %s1643_s15, 0 }
 0x472   :  { %1647 = shalt.err (%p2052_p12)  }

</bundles_post_ra>
